<compile_context>
chip_gen: v7x
topology: tpu7x:2x2x1
jax: 0.10.0
libtpu: 0.0.40
codegen_flags: <defaults>
</compile_context>

<pallas_src>
import functools

import jax
import jax.numpy as jnp
from jax.experimental import pallas as pl
from jax.experimental.pallas import tpu as pltpu

LN_EPS = 1e-5   # torch.nn.LayerNorm default
LANE = 128
SUBLANE_PACK = 16  # works for both f32 (8) and bf16 (16) sublane packing


def _round_up(x, m):
    return ((x + m - 1) // m) * m


# ----------------------------------------------------------------------------
# Pallas kernel: fused 3-layer MLP + LayerNorm over one tile of rows.
# All refs are lane-dense (feature dims padded to a multiple of 128); padded
# weight/bias/gamma/beta columns are zero, so padded columns of h stay exactly
# zero and LayerNorm statistics are taken over the real `latent_real` columns.
# ----------------------------------------------------------------------------
def _mlp_ln_kernel(mid_ref,                     # scalar-prefetch (unused in body)
                   x_ref, w0_ref, b0_ref, w1_ref, b1_ref, w2_ref, b2_ref,
                   g_ref, beta_ref, o_ref, *, latent_real):
    cdt = w0_ref.dtype  # compute dtype for the MXU (f32 or bf16)

    # Layer 0: Linear(in, latent) + ReLU      (f32 accumulate on the MXU)
    h = jnp.dot(x_ref[...], w0_ref[...],
                preferred_element_type=jnp.float32) + b0_ref[...]
    h = jnp.maximum(h, 0.0)
    # Layer 1: Linear(latent, latent) + ReLU
    h = jnp.dot(h.astype(cdt), w1_ref[...],
                preferred_element_type=jnp.float32) + b1_ref[...]
    h = jnp.maximum(h, 0.0)
    # Final Linear(latent, latent) (no activation)
    h = jnp.dot(h.astype(cdt), w2_ref[...],
                preferred_element_type=jnp.float32) + b2_ref[...]

    # LayerNorm over the real latent columns (padded columns of h are zero,
    # so sums over the full lane width equal sums over the real columns).
    inv_l = 1.0 / float(latent_real)
    mean = jnp.sum(h, axis=-1, keepdims=True) * inv_l
    if latent_real == h.shape[-1]:
        centered = h - mean                      # no padded lanes -> no mask
    else:
        lane_idx = jax.lax.broadcasted_iota(jnp.int32, h.shape, dimension=1)
        centered = jnp.where(lane_idx < latent_real, h - mean, 0.0)
    var = jnp.sum(centered * centered, axis=-1, keepdims=True) * inv_l
    norm = centered * jax.lax.rsqrt(var + LN_EPS)
    # gamma/beta are zero in padded columns -> padded output columns are 0.
    o_ref[...] = (norm * g_ref[...] + beta_ref[...]).astype(o_ref.dtype)


# ----------------------------------------------------------------------------
# Single fused launch for node-MLP and edge-MLP.
# ----------------------------------------------------------------------------
def _pad2(a, rows, cols):
    return jnp.pad(a, ((0, rows - a.shape[0]), (0, cols - a.shape[1])))


def fused_encoder_mlps(x, edge_attr, node_params, edge_params, *,
                       tile_rows=256, compute_dtype=jnp.float32):
    out_dtype = x.dtype
    n_nodes, in_f = x.shape
    n_edges = edge_attr.shape[0]
    latent = node_params["w2"].shape[1]

    fp = _round_up(in_f, LANE)       # lane-dense input width
    lp = _round_up(latent, LANE)     # lane-dense latent width

    # Row tile: multiple of 16 (f32 + bf16 sublane packing), shrunk for tiny
    # graphs so we don't pad 16 real rows up to 256.
    largest_set = max(n_nodes, n_edges, 1)
    tile_rows = max(SUBLANE_PACK,
                    min(_round_up(tile_rows, SUBLANE_PACK),
                        _round_up(largest_set, SUBLANE_PACK)))

    # Pad each row set up to a tile boundary, then concatenate node|edge rows.
    n_node_pad = _round_up(max(n_nodes, 1), tile_rows)
    n_edge_pad = _round_up(max(n_edges, 1), tile_rows)
    x_pad = _pad2(x, n_node_pad, fp)
    e_pad = _pad2(edge_attr, n_edge_pad, fp)
    rows = jnp.concatenate([x_pad, e_pad], axis=0).astype(compute_dtype)

    total_rows = n_node_pad + n_edge_pad
    num_tiles = total_rows // tile_rows
    node_tiles = n_node_pad // tile_rows

    # Per-tile model id (scalar-prefetch): 0 -> node params, 1 -> edge params.
    model_id = (jnp.arange(num_tiles, dtype=jnp.int32) >= node_tiles
                ).astype(jnp.int32)

    def stack(name, r, c, dtype):
        return jnp.stack([_pad2(node_params[name], r, c),
                          _pad2(edge_params[name], r, c)]).astype(dtype)

    w0 = stack("w0", fp, lp, compute_dtype)
    w1 = stack("w1", lp, lp, compute_dtype)
    w2 = stack("w2", lp, lp, compute_dtype)
    b0 = stack("b0", 1, lp, jnp.float32)
    b1 = stack("b1", 1, lp, jnp.float32)
    b2 = stack("b2", 1, lp, jnp.float32)
    gamma = stack("gamma", 1, lp, jnp.float32)
    beta = stack("beta", 1, lp, jnp.float32)

    def param_spec(r, c):
        # Leading size-2 "model" axis is selected per-tile via scalar prefetch
        # and squeezed out (None) so the kernel sees a plain (r, c) ref.
        return pl.BlockSpec((None, r, c), lambda i, mid: (mid[i], 0, 0))

    itemsize = jnp.dtype(compute_dtype).itemsize
    flops = 2 * total_rows * (fp * lp + 2 * lp * lp)
    bytes_accessed = (total_rows * fp * itemsize                   # x rows in
                      + total_rows * lp * jnp.dtype(out_dtype).itemsize  # out
                      + 2 * (fp * lp + 2 * lp * lp) * itemsize     # weights
                      + 2 * 5 * lp * 4)                            # bias / LN

    out = pl.pallas_call(
        functools.partial(_mlp_ln_kernel, latent_real=latent),
        out_shape=jax.ShapeDtypeStruct((total_rows, lp), out_dtype),
        grid_spec=pltpu.PrefetchScalarGridSpec(
            num_scalar_prefetch=1,
            grid=(num_tiles,),
            in_specs=[
                pl.BlockSpec((tile_rows, fp), lambda i, mid: (i, 0)),  # row tile
                param_spec(fp, lp), param_spec(1, lp),                 # layer 0
                param_spec(lp, lp), param_spec(1, lp),                 # layer 1
                param_spec(lp, lp), param_spec(1, lp),                 # final
                param_spec(1, lp), param_spec(1, lp),                  # LN g/b
            ],
            out_specs=pl.BlockSpec((tile_rows, lp), lambda i, mid: (i, 0)),
        ),
        compiler_params=pltpu.CompilerParams(
            dimension_semantics=("parallel",),
            vmem_limit_bytes=64 * 1024 * 1024),
        cost_estimate=pl.CostEstimate(
            flops=flops, transcendentals=total_rows,
            bytes_accessed=bytes_accessed),
    )(model_id, rows, w0, b0, w1, b1, w2, b2, gamma, beta)

    nodes_out = out[:n_nodes, :latent]
    edges_out = out[n_node_pad:n_node_pad + n_edges, :latent]
    return nodes_out, edges_out


# ----------------------------------------------------------------------------
# Parameter init (deterministic, mimics torch.nn.Linear uniform init bounds).
# ----------------------------------------------------------------------------
def init_mlp_params(key, input_size, latent_size):
    ks = jax.random.split(key, 6)

    def lin(kw, kb, fan_in, fan_out):
        bound = 1.0 / jnp.sqrt(fan_in)
        w = jax.random.uniform(kw, (fan_in, fan_out), jnp.float32, -bound, bound)
        b = jax.random.uniform(kb, (1, fan_out), jnp.float32, -bound, bound)
        return w, b

    w0, b0 = lin(ks[0], ks[1], input_size, latent_size)
    w1, b1 = lin(ks[2], ks[3], latent_size, latent_size)
    w2, b2 = lin(ks[4], ks[5], latent_size, latent_size)
    return {
        "w0": w0, "b0": b0,
        "w1": w1, "b1": b1,
        "w2": w2, "b2": b2,
        "gamma": jnp.ones((1, latent_size), jnp.float32),
        "beta": jnp.zeros((1, latent_size), jnp.float32),
    }


# ----------------------------------------------------------------------------
# Encoder forward: node_model(graph.x), edge_model(graph.edge_attr);
# edge_index and batch pass through unchanged (Batch container -> dict).
# ----------------------------------------------------------------------------
def encoder_forward(graph, node_params, edge_params, *,
                    tile_rows=256, compute_dtype=jnp.float32):
    nodes_out, edges_out = fused_encoder_mlps(
        graph["x"], graph["edge_attr"], node_params, edge_params,
        tile_rows=tile_rows, compute_dtype=compute_dtype)
    return {
        "x": nodes_out,
        "edge_index": graph["edge_index"],
        "edge_attr": edges_out,
        "batch": graph["batch"],
    }


# Pure-JAX reference (same compute dtype for the matmuls, f32 LayerNorm).
def _mlp_ln_ref(x, p, compute_dtype=jnp.float32):
    cdt = compute_dtype
    h = jnp.dot(x.astype(cdt), p["w0"].astype(cdt),
                preferred_element_type=jnp.float32) + p["b0"]
    h = jnp.maximum(h, 0.0)
    h = jnp.dot(h.astype(cdt), p["w1"].astype(cdt),
                preferred_element_type=jnp.float32) + p["b1"]
    h = jnp.maximum(h, 0.0)
    h = jnp.dot(h.astype(cdt), p["w2"].astype(cdt),
                preferred_element_type=jnp.float32) + p["b2"]
    mean = jnp.mean(h, axis=-1, keepdims=True)
    var = jnp.mean(jnp.square(h - mean), axis=-1, keepdims=True)
    return (h - mean) * jax.lax.rsqrt(var + LN_EPS) * p["gamma"] + p["beta"]


if __name__ == "__main__":
    key = jax.random.PRNGKey(0)
    k_node, k_edge, k_x, k_e = jax.random.split(key, 4)

    input_size = 16
    latent_size = 32
    num_nodes = 16
    num_edges = 32

    node_params = init_mlp_params(k_node, input_size, latent_size)
    edge_params = init_mlp_params(k_edge, input_size, latent_size)

    graph = {
        "x": jax.random.normal(k_x, (num_nodes, input_size), jnp.float32),
        "edge_attr": jax.random.normal(k_e, (num_edges, input_size), jnp.float32),
        "edge_index": jnp.stack(
            [jnp.arange(num_edges) % num_nodes,
             (jnp.arange(num_edges) + 1) % num_nodes]).astype(jnp.int32),
        "batch": jnp.zeros((num_nodes,), jnp.int32),
    }

    # bf16 matmuls (f32 accumulate) pay off on v6e/v7x; keep f32 on v5e/older.
    kind = jax.devices()[0].device_kind.lower()
    use_bf16 = ("v6" in kind) or ("v7" in kind)
    compute_dtype = jnp.bfloat16 if use_bf16 else jnp.float32

    out = encoder_forward(graph, node_params, edge_params,
                          tile_rows=256, compute_dtype=compute_dtype)
    jax.block_until_ready(out)

    # quiet correctness check against pure-JAX reference (same compute dtype)
    ref_x = _mlp_ln_ref(graph["x"], node_params, compute_dtype)
    ref_e = _mlp_ln_ref(graph["edge_attr"], edge_params, compute_dtype)
    tol = 2e-2 if use_bf16 else 1e-4
    assert jnp.allclose(out["x"], ref_x, atol=tol, rtol=tol)
    assert jnp.allclose(out["edge_attr"], ref_e, atol=tol, rtol=tol)
    assert out["x"].shape == (num_nodes, latent_size)
    assert out["edge_attr"].shape == (num_edges, latent_size)
    assert out["x"].dtype == graph["x"].dtype

    print("KERNEL_OK")
</pallas_src>

<mosaic_0001>
module attributes {stable_mosaic.version = 11 : i64} {
  func.func @_mlp_ln_kernel(%arg0: i32, %arg1: memref<2xi32, #tpu.memory_space<smem>>, %arg2: memref<32x128xf32, #tpu.memory_space<vmem>>, %arg3: memref<1x128x128xf32, #tpu.memory_space<vmem>>, %arg4: memref<1x1x128xf32, #tpu.memory_space<vmem>>, %arg5: memref<1x128x128xf32, #tpu.memory_space<vmem>>, %arg6: memref<1x1x128xf32, #tpu.memory_space<vmem>>, %arg7: memref<1x128x128xf32, #tpu.memory_space<vmem>>, %arg8: memref<1x1x128xf32, #tpu.memory_space<vmem>>, %arg9: memref<1x1x128xf32, #tpu.memory_space<vmem>>, %arg10: memref<1x1x128xf32, #tpu.memory_space<vmem>>, %arg11: memref<32x128xf32, #tpu.memory_space<vmem>>) attributes {dimension_semantics = [#tpu.dimension_semantics<parallel>], iteration_bounds = array<i64: 2>, scalar_prefetch = 1 : i64, scratch_operands = 0 : i64, tpu.core_type = #tpu.core_type<tc>, window_params = [{transform_indices = @transform_0, window_bounds = array<i64: 32, 128>}, {transform_indices = @transform_1, window_bounds = array<i64: 1, 128, 128>}, {transform_indices = @transform_2, window_bounds = array<i64: 1, 1, 128>}, {transform_indices = @transform_3, window_bounds = array<i64: 1, 128, 128>}, {transform_indices = @transform_4, window_bounds = array<i64: 1, 1, 128>}, {transform_indices = @transform_5, window_bounds = array<i64: 1, 128, 128>}, {transform_indices = @transform_6, window_bounds = array<i64: 1, 1, 128>}, {transform_indices = @transform_7, window_bounds = array<i64: 1, 1, 128>}, {transform_indices = @transform_8, window_bounds = array<i64: 1, 1, 128>}, {transform_indices = @transform_9, window_bounds = array<i64: 32, 128>}]} {
    %c0 = arith.constant 0 : index
    %c0_0 = arith.constant 0 : index
    %0 = vector.load %arg2[%c0, %c0_0] : memref<32x128xf32, #tpu.memory_space<vmem>>, vector<32x128xf32>
    %c0_1 = arith.constant 0 : index
    %c0_2 = arith.constant 0 : index
    %c0_3 = arith.constant 0 : index
    %1 = vector.load %arg3[%c0_1, %c0_2, %c0_3] : memref<1x128x128xf32, #tpu.memory_space<vmem>>, vector<1x128x128xf32>
    %2 = vector.shape_cast %1 : vector<1x128x128xf32> to vector<128x128xf32>
    %cst = arith.constant dense<0.000000e+00> : vector<32x128xf32>
    %3 = tpu.matmul %0, %2, %cst {dimension_numbers = #tpu.dot_dimension_numbers<[1], [0], [0], [1], [0, 0, 1, 1], [], []>} : vector<32x128xf32>, vector<128x128xf32>, vector<32x128xf32> -> vector<32x128xf32>
    %c0_4 = arith.constant 0 : index
    %c0_5 = arith.constant 0 : index
    %c0_6 = arith.constant 0 : index
    %4 = vector.load %arg4[%c0_4, %c0_5, %c0_6] : memref<1x1x128xf32, #tpu.memory_space<vmem>>, vector<1x1x128xf32>
    %5 = vector.shape_cast %4 : vector<1x1x128xf32> to vector<1x128xf32>
    %6 = vector.broadcast %5 : vector<1x128xf32> to vector<32x128xf32>
    %7 = arith.addf %3, %6 : vector<32x128xf32>
    %cst_7 = arith.constant 0.000000e+00 : f32
    %8 = vector.broadcast %cst_7 : f32 to vector<32x128xf32>
    %9 = arith.maximumf %7, %8 : vector<32x128xf32>
    %c0_8 = arith.constant 0 : index
    %c0_9 = arith.constant 0 : index
    %c0_10 = arith.constant 0 : index
    %10 = vector.load %arg5[%c0_8, %c0_9, %c0_10] : memref<1x128x128xf32, #tpu.memory_space<vmem>>, vector<1x128x128xf32>
    %11 = vector.shape_cast %10 : vector<1x128x128xf32> to vector<128x128xf32>
    %cst_11 = arith.constant dense<0.000000e+00> : vector<32x128xf32>
    %12 = tpu.matmul %9, %11, %cst_11 {dimension_numbers = #tpu.dot_dimension_numbers<[1], [0], [0], [1], [0, 0, 1, 1], [], []>} : vector<32x128xf32>, vector<128x128xf32>, vector<32x128xf32> -> vector<32x128xf32>
    %c0_12 = arith.constant 0 : index
    %c0_13 = arith.constant 0 : index
    %c0_14 = arith.constant 0 : index
    %13 = vector.load %arg6[%c0_12, %c0_13, %c0_14] : memref<1x1x128xf32, #tpu.memory_space<vmem>>, vector<1x1x128xf32>
    %14 = vector.shape_cast %13 : vector<1x1x128xf32> to vector<1x128xf32>
    %15 = vector.broadcast %14 : vector<1x128xf32> to vector<32x128xf32>
    %16 = arith.addf %12, %15 : vector<32x128xf32>
    %cst_15 = arith.constant 0.000000e+00 : f32
    %17 = vector.broadcast %cst_15 : f32 to vector<32x128xf32>
    %18 = arith.maximumf %16, %17 : vector<32x128xf32>
    %c0_16 = arith.constant 0 : index
    %c0_17 = arith.constant 0 : index
    %c0_18 = arith.constant 0 : index
    %19 = vector.load %arg7[%c0_16, %c0_17, %c0_18] : memref<1x128x128xf32, #tpu.memory_space<vmem>>, vector<1x128x128xf32>
    %20 = vector.shape_cast %19 : vector<1x128x128xf32> to vector<128x128xf32>
    %cst_19 = arith.constant dense<0.000000e+00> : vector<32x128xf32>
    %21 = tpu.matmul %18, %20, %cst_19 {dimension_numbers = #tpu.dot_dimension_numbers<[1], [0], [0], [1], [0, 0, 1, 1], [], []>} : vector<32x128xf32>, vector<128x128xf32>, vector<32x128xf32> -> vector<32x128xf32>
    %c0_20 = arith.constant 0 : index
    %c0_21 = arith.constant 0 : index
    %c0_22 = arith.constant 0 : index
    %22 = vector.load %arg8[%c0_20, %c0_21, %c0_22] : memref<1x1x128xf32, #tpu.memory_space<vmem>>, vector<1x1x128xf32>
    %23 = vector.shape_cast %22 : vector<1x1x128xf32> to vector<1x128xf32>
    %24 = vector.broadcast %23 : vector<1x128xf32> to vector<32x128xf32>
    %25 = arith.addf %21, %24 : vector<32x128xf32>
    %cst_23 = arith.constant dense<0.000000e+00> : vector<32xf32>
    %26 = vector.multi_reduction <add>, %25, %cst_23 [1] : vector<32x128xf32> to vector<32xf32>
    %27 = vector.shape_cast %26 : vector<32xf32> to vector<32x1xf32>
    %cst_24 = arith.constant 3.125000e-02 : f32
    %28 = vector.broadcast %cst_24 : f32 to vector<32x1xf32>
    %29 = arith.mulf %27, %28 : vector<32x1xf32>
    %30 = tpu.iota {dimensions = array<i32: 1>} : vector<32x128xi32>
    %c32_i32 = arith.constant 32 : i32
    %31 = vector.broadcast %c32_i32 : i32 to vector<32x128xi32>
    %32 = arith.cmpi slt, %30, %31 : vector<32x128xi32>
    %33 = vector.broadcast %29 : vector<32x1xf32> to vector<32x128xf32>
    %34 = arith.subf %25, %33 : vector<32x128xf32>
    %cst_25 = arith.constant 0.000000e+00 : f32
    %35 = vector.broadcast %cst_25 : f32 to vector<32x128xf32>
    %36 = arith.select %32, %34, %35 : vector<32x128xi1>, vector<32x128xf32>
    %37 = arith.mulf %36, %36 : vector<32x128xf32>
    %cst_26 = arith.constant dense<0.000000e+00> : vector<32xf32>
    %38 = vector.multi_reduction <add>, %37, %cst_26 [1] : vector<32x128xf32> to vector<32xf32>
    %39 = vector.shape_cast %38 : vector<32xf32> to vector<32x1xf32>
    %cst_27 = arith.constant 3.125000e-02 : f32
    %40 = vector.broadcast %cst_27 : f32 to vector<32x1xf32>
    %41 = arith.mulf %39, %40 : vector<32x1xf32>
    %cst_28 = arith.constant 9.99999974E-6 : f32
    %42 = vector.broadcast %cst_28 : f32 to vector<32x1xf32>
    %43 = arith.addf %41, %42 : vector<32x1xf32>
    %44 = math.rsqrt %43 : vector<32x1xf32>
    %45 = vector.broadcast %44 : vector<32x1xf32> to vector<32x128xf32>
    %46 = arith.mulf %36, %45 : vector<32x128xf32>
    %c0_29 = arith.constant 0 : index
    %c0_30 = arith.constant 0 : index
    %c0_31 = arith.constant 0 : index
    %47 = vector.load %arg9[%c0_29, %c0_30, %c0_31] : memref<1x1x128xf32, #tpu.memory_space<vmem>>, vector<1x1x128xf32>
    %48 = vector.shape_cast %47 : vector<1x1x128xf32> to vector<1x128xf32>
    %49 = vector.broadcast %48 : vector<1x128xf32> to vector<32x128xf32>
    %50 = arith.mulf %46, %49 : vector<32x128xf32>
    %c0_32 = arith.constant 0 : index
    %c0_33 = arith.constant 0 : index
    %c0_34 = arith.constant 0 : index
    %51 = vector.load %arg10[%c0_32, %c0_33, %c0_34] : memref<1x1x128xf32, #tpu.memory_space<vmem>>, vector<1x1x128xf32>
    %52 = vector.shape_cast %51 : vector<1x1x128xf32> to vector<1x128xf32>
    %53 = vector.broadcast %52 : vector<1x128xf32> to vector<32x128xf32>
    %54 = arith.addf %50, %53 : vector<32x128xf32>
    %c0_35 = arith.constant 0 : index
    %c0_36 = arith.constant 0 : index
    %55 = vector.load %arg11[%c0_35, %c0_36] : memref<32x128xf32, #tpu.memory_space<vmem>>, vector<32x128xf32>
    tpu.vector_store %arg11[%c0_35, %c0_36], %54 {strides = array<i32>} : memref<32x128xf32, #tpu.memory_space<vmem>>, vector<32x128xf32>,
    return
  }
  func.func @transform_0(%arg0: i32, %arg1: memref<2xi32, #tpu.memory_space<smem>>) -> (i32, i32) {
    %c0_i32 = arith.constant 0 : i32
    %c0_i32_0 = arith.constant 0 : i32
    return %arg0, %c0_i32 : i32, i32
  }
  func.func @transform_1(%arg0: i32, %arg1: memref<2xi32, #tpu.memory_space<smem>>) -> (i32, i32, i32) {
    %0 = arith.index_cast %arg0 : i32 to index
    %1 = memref.load %arg1[%0] : memref<2xi32, #tpu.memory_space<smem>>
    %c0_i32 = arith.constant 0 : i32
    %c0_i32_0 = arith.constant 0 : i32
    %c0_i32_1 = arith.constant 0 : i32
    return %1, %c0_i32, %c0_i32_0 : i32, i32, i32
  }
  func.func @transform_2(%arg0: i32, %arg1: memref<2xi32, #tpu.memory_space<smem>>) -> (i32, i32, i32) {
    %0 = arith.index_cast %arg0 : i32 to index
    %1 = memref.load %arg1[%0] : memref<2xi32, #tpu.memory_space<smem>>
    %c0_i32 = arith.constant 0 : i32
    %c0_i32_0 = arith.constant 0 : i32
    %c0_i32_1 = arith.constant 0 : i32
    return %1, %c0_i32, %c0_i32_0 : i32, i32, i32
  }
  func.func @transform_3(%arg0: i32, %arg1: memref<2xi32, #tpu.memory_space<smem>>) -> (i32, i32, i32) {
    %0 = arith.index_cast %arg0 : i32 to index
    %1 = memref.load %arg1[%0] : memref<2xi32, #tpu.memory_space<smem>>
    %c0_i32 = arith.constant 0 : i32
    %c0_i32_0 = arith.constant 0 : i32
    %c0_i32_1 = arith.constant 0 : i32
    return %1, %c0_i32, %c0_i32_0 : i32, i32, i32
  }
  func.func @transform_4(%arg0: i32, %arg1: memref<2xi32, #tpu.memory_space<smem>>) -> (i32, i32, i32) {
    %0 = arith.index_cast %arg0 : i32 to index
    %1 = memref.load %arg1[%0] : memref<2xi32, #tpu.memory_space<smem>>
    %c0_i32 = arith.constant 0 : i32
    %c0_i32_0 = arith.constant 0 : i32
    %c0_i32_1 = arith.constant 0 : i32
    return %1, %c0_i32, %c0_i32_0 : i32, i32, i32
  }
  func.func @transform_5(%arg0: i32, %arg1: memref<2xi32, #tpu.memory_space<smem>>) -> (i32, i32, i32) {
    %0 = arith.index_cast %arg0 : i32 to index
    %1 = memref.load %arg1[%0] : memref<2xi32, #tpu.memory_space<smem>>
    %c0_i32 = arith.constant 0 : i32
    %c0_i32_0 = arith.constant 0 : i32
    %c0_i32_1 = arith.constant 0 : i32
    return %1, %c0_i32, %c0_i32_0 : i32, i32, i32
  }
  func.func @transform_6(%arg0: i32, %arg1: memref<2xi32, #tpu.memory_space<smem>>) -> (i32, i32, i32) {
    %0 = arith.index_cast %arg0 : i32 to index
    %1 = memref.load %arg1[%0] : memref<2xi32, #tpu.memory_space<smem>>
    %c0_i32 = arith.constant 0 : i32
    %c0_i32_0 = arith.constant 0 : i32
    %c0_i32_1 = arith.constant 0 : i32
    return %1, %c0_i32, %c0_i32_0 : i32, i32, i32
  }
  func.func @transform_7(%arg0: i32, %arg1: memref<2xi32, #tpu.memory_space<smem>>) -> (i32, i32, i32) {
    %0 = arith.index_cast %arg0 : i32 to index
    %1 = memref.load %arg1[%0] : memref<2xi32, #tpu.memory_space<smem>>
    %c0_i32 = arith.constant 0 : i32
    %c0_i32_0 = arith.constant 0 : i32
    %c0_i32_1 = arith.constant 0 : i32
    return %1, %c0_i32, %c0_i32_0 : i32, i32, i32
  }
  func.func @transform_8(%arg0: i32, %arg1: memref<2xi32, #tpu.memory_space<smem>>) -> (i32, i32, i32) {
    %0 = arith.index_cast %arg0 : i32 to index
    %1 = memref.load %arg1[%0] : memref<2xi32, #tpu.memory_space<smem>>
    %c0_i32 = arith.constant 0 : i32
    %c0_i32_0 = arith.constant 0 : i32
    %c0_i32_1 = arith.constant 0 : i32
    return %1, %c0_i32, %c0_i32_0 : i32, i32, i32
  }
  func.func @transform_9(%arg0: i32, %arg1: memref<2xi32, #tpu.memory_space<smem>>) -> (i32, i32) {
    %c0_i32 = arith.constant 0 : i32
    %c0_i32_0 = arith.constant 0 : i32
    return %arg0, %c0_i32 : i32, i32
  }
}

</mosaic_0001>

<bundles_post_ra>
// kernel: tpu_custom_call.1
= control target key start
LH: loop header
LB: loop body
LE: loop exit
PB: predicated region body
PF: predicated region fallthrough
CT: control target
= control target key end

     0   :  { %s3789_s0 = inlined_call_operand.hbm [shape: s32[2], index: 0, kind: input, shape index: {}]   ;;  %s3790_s1 = inlined_call_operand.hbm [shape: f32[64,128], index: 1, kind: input, shape index: {}]   ;;  %s3791_s2 = inlined_call_operand.hbm [shape: f32[2,128,128], index: 2, kind: input, shape index: {}]   ;;  %s3792_s3 = inlined_call_operand.hbm [shape: f32[2,1,128], index: 3, kind: input, shape index: {}]   ;;  %s3793_s4 = inlined_call_operand.hbm [shape: f32[2,128,128], index: 4, kind: input, shape index: {}]   ;;  %s3794_s5 = inlined_call_operand.hbm [shape: f32[2,1,128], index: 5, kind: input, shape index: {}]   ;;  %s3795_s6 = inlined_call_operand.hbm [shape: f32[2,128,128], index: 6, kind: input, shape index: {}]   ;;  %s3796_s7 = inlined_call_operand.hbm [shape: f32[2,1,128], index: 7, kind: input, shape index: {}]   ;;  %s3797_s8 = inlined_call_operand.hbm [shape: f32[2,1,128], index: 8, kind: input, shape index: {}]   ;;  %s3798_s9 = inlined_call_operand.hbm [shape: f32[2,1,128], index: 9, kind: input, shape index: {}]   ;;  %s3799_s10 = inlined_call_operand.hbm [shape: f32[64,128], index: 10, kind: output, shape index: {}]  }
   0x1   :  { %3860 = sst [smem:[#allocation78_spill]] %s3790_s1  ;;  %s1975_s15 = scalar_lea.hbm %s3789_s0, 16 }
   0x2   :  { %3861 = sst [smem:[#allocation79_spill]] %s3791_s2  ;;  %p1976_p0 = scmp.ne.s32.totalorder %s3789_s0, %s1975_s15 }
   0x3   :  { %3862 = sst [smem:[#allocation80_spill]] %s3792_s3  ;;  %p1979_p1 = scmp.lt.u32.totalorder %s1975_s15, %s3789_s0 }
   0x4   :  { %3863 = sst [smem:[#allocation81_spill]] %s3793_s4 }
   0x5   :  { %3864 = sst [smem:[#allocation82_spill]] %s3794_s5  ;;  %p1981_p2 = pnand %p1979_p1, %p1976_p0 }
   0x6   :  { %3865 = sst [smem:[#allocation83_spill]] %s3795_s6 }
   0x7   :  { %3866 = sst [smem:[#allocation84_spill]] %s3796_s7 }
   0x8   :  { %3867 = sst [smem:[#allocation85_spill]] %s3797_s8 }
   0x9   :  { %3868 = sst [smem:[#allocation86_spill]] %s3798_s9 }
   0xa   :  { %3869 = sst [smem:[#allocation87_spill]] %s3799_s10 }
   0xb   :  { %1984 = shalt.err (!%p1981_p2)  }
   0xc   :  { %s2549_s20 = smov [#allocation3]  }
   0xd   :  { %16 = dma.hbm_to_smem %s3789_s0, 16, %s2549_s20, [#allocation2] }
   0xe   :  { %2395 = dma.done.wait [#allocation2], 16 }
   0xf   :  { %2396 = vsyncadd [#allocation2], 4294967280 }
  0x10   :  { %18 = sfence }
  0x11   :  { %19 = vsyncpa [#allocation5], 0 }
  0x12   :  { %21 = vsyncpa [#allocation5 + $0x1], 0 }
  0x13   :  { %22 = vsyncpa [#allocation8], 0 }
  0x14   :  { %24 = vsyncpa [#allocation8 + $0x1], 0 }
  0x15   :  { %25 = vsyncpa [#allocation11], 0 }
  0x16   :  { %27 = vsyncpa [#allocation11 + $0x1], 0 }
  0x17   :  { %28 = vsyncpa [#allocation14], 0 }
  0x18   :  { %30 = vsyncpa [#allocation14 + $0x1], 0 }
  0x19   :  { %31 = vsyncpa [#allocation17], 0 }
  0x1a   :  { %33 = vsyncpa [#allocation17 + $0x1], 0 }
  0x1b   :  { %34 = vsyncpa [#allocation6], 0 }
  0x1c   :  { %36 = vsyncpa [#allocation6 + $0x1], 0  ;;  %s2631_s23 = smov 0   ;;  %s2633_s24 = smov 0  }
  0x1d   :  { %s2635_s0 = smov 0   ;;  %s2637_s25 = smov 0  }
  0x1e   :  { %3870 = sst [smem:[#allocation47_spill]] %s2635_s0  ;;  %s2639_s26 = smov 0  }
  0x1f   :  { %s2641_s27 = smov 0   ;;  %s2643_s28 = smov 0  }
  0x20   :  { %s2645_s29 = smov 0   ;;  %s2647_s30 = smov 0  }
  0x21   :  { %s2649_s11 = smov 0   ;;  %s2651_s12 = smov 0  }
  0x22   :  { %s2653_s13 = smov 0   ;;  %s2655_s14 = smov 0  }
  0x23   :  { %s2657_s15 = smov 0   ;;  %s2659_s16 = smov 0  }
  0x24   :  { %s2661_s17 = smov 0   ;;  %s2663_s18 = smov 0  }
  0x25   :  { %3871 = sst [smem:[#allocation48_spill]] %s2661_s17  ;;  %s2665_s19 = smov 0  }
  0x26   :  { %s2667_s20 = smov 0   ;;  %s2669_s21 = smov 0  }
  0x27   :  { %s2671_s22 = smov 0   ;;  %s2673_s10 = smov 0  }
  0x28   :  { %s2675_s9 = smov 0   ;;  %s2677_s7 = smov 0  }
  0x29   :  { %s2679_s5 = smov 0   ;;  %s2681_s3 = smov 0  }
  0x2a   :  { %s2683_s1 = smov 0   ;;  %s2685_s8 = smov 0  }
  0x2b LB: > { %s3874_s0 = sld [smem:[#allocation47_spill]]  ;;  %s3875_s17 = sld [smem:[#allocation48_spill]]  ;;  %s2547_s8 = sphi %s2685_s8, %s4087_s8   ;;  %s2543_s1 = sphi %s2683_s1, %s4086_s1   ;;  %s2539_s3 = sphi %s2681_s3, %s4085_s3   ;;  %s2535_s5 = sphi %s2679_s5, %s4084_s5   ;;  %s2531_s7 = sphi %s2677_s7, %s4083_s7   ;;  %s2527_s9 = sphi %s2675_s9, %s4082_s9   ;;  %s2523_s10 = sphi %s2673_s10, %s4068_s10   ;;  %s2519_s22 = sphi %s2671_s22, %s4067_s22   ;;  %s2515_s21 = sphi %s2669_s21, %s4065_s21   ;;  %s2511_s20 = sphi %s2667_s20, %s4081_s20   ;;  %s2507_s19 = sphi %s2665_s19, %s4061_s19   ;;  %s2503_s18 = sphi %s2663_s18, %s4080_s18   ;;  %s2495_s16 = sphi %s2659_s16, %s4078_s16   ;;  %s2491_s15 = sphi %s2657_s15, %s4058_s15   ;;  %s2487_s14 = sphi %s2655_s14, %s4076_s14   ;;  %s2483_s13 = sphi %s2653_s13, %s4056_s13   ;;  %s2479_s12 = sphi %s2651_s12, %s4073_s12   ;;  %s2475_s11 = sphi %s2649_s11, %s4071_s11   ;;  %s2471_s30 = sphi %s2647_s30, %s4054_s30   ;;  %s2467_s29 = sphi %s2645_s29, %s4053_s29   ;;  %s2463_s28 = sphi %s2643_s28, %s4052_s28   ;;  %s2459_s27 = sphi %s2641_s27, %s4051_s27   ;;  %s2455_s26 = sphi %s2639_s26, %s4066_s26   ;;  %s2451_s25 = sphi %s2637_s25, %s4064_s25   ;;  %s2443_s24 = sphi %s2633_s24, %s4049_s24   ;;  %s2439_s23 = sphi %s2631_s23, %s4048_s23  }
  0x2c   : > { %3876 = sst [smem:[#allocation47_spill]] %s2439_s23  ;;  %s2770_s23 = sadd.s32 4294967295, %s2547_s8  }
  0x2d   : > { %3877 = sst [smem:[#allocation48_spill]] %s2443_s24  ;;  %p3823_p3 = scmp.eq.s32.totalorder %s2547_s8, 0 }
  0x2e   : > { %3879 = sst [smem:[#allocation50_spill]] %s2459_s27  ;;  %p3822_p4 = scmp.eq.s32.totalorder %s2770_s23, 0 }
  0x2f   : > { %3880 = sst [smem:[#allocation51_spill]] %s2463_s28  ;;  %p84_p5 = scmp.ne.s32.totalorder %s2531_s7, %s2527_s9 }
  0x30   : > { %3881 = sst [smem:[#allocation52_spill]] %s2467_s29  ;;  %p90_p6 = scmp.ne.s32.totalorder %s2527_s9, %s2523_s10 }
  0x31   : > { %3878 = sst [smem:[#allocation49_spill]] %s3874_s0  ;;  %s2773_s0 = sadd.s32 1, %s2547_s8  }
  0x32   : > { %3882 = sst [smem:[#allocation53_spill]] %s2471_s30  ;;  %s77_s30 = sadd.s32 1, %s2531_s7 }
  0x33   : > { %3883 = sst [smem:[#allocation54_spill]] %s2483_s13  ;;  %p2786_p8 = por %p84_p5, %p3823_p3 }
  0x34   : > { %3884 = sst [smem:[#allocation55_spill]] %s2487_s14  ;;  %p3821_p9 = scmp.lt.s32.totalorder %s2547_s8, 2 }
  0x35   : > { %3885 = sst [smem:[#allocation56_spill]] %s2491_s15  ;;  %p2793_p10 = por %p90_p6, %p3822_p4 }
  0x36   : > { %3886 = sst [smem:[#allocation57_spill]] %s2495_s16  ;;  %s3895_s16 = smov %s2773_s0 }
  0x37   : > { %3887 = sst [smem:[#allocation58_spill]] %s2507_s19  ;;  %s2798_s14 = sand.u32 1, %s2547_s8  }
  0x38   : > { %3888 = sst [smem:[#allocation59_spill]] %s2511_s20  ;;  %p2805_p12 = pnand %p3821_p9, %p2786_p8 }
  0x39   : > { %3889 = sst [smem:[#allocation60_spill]] %s2515_s21  ;;  %p1345_p13 = scmp.ge.s32.totalorder %s2547_s8, 1 }
  0x3a   : > { %3890 = sst [smem:[#allocation61_spill]] %s2519_s22  ;;  %p511_p0 = scmp.lt.s32.totalorder %s2547_s8, 3 }
  0x3b   : > { %3891 = sst [smem:[#allocation62_spill]] %s2527_s9  ;;  %s359_s9 = sand.u32 1, %s2531_s7  }
  0x3c   : > { %3892 = sst [smem:[#allocation63_spill]] %s2531_s7  ;;  %s1331_s15 = sshll.u32 %s359_s9, 7 }
  0x3d   : > { %3893 = sst [smem:[#allocation64_spill]] %s2535_s5  ;;  %s361_s9 = scalar_lea.vmem [#allocation7], %s1331_s15 }
  0x3e   : > { %3894 = sst [smem:[#allocation65_spill]] %s2543_s1  ;;  %p2825_p1 = pnand %p1345_p13, %p511_p0 }
  0x3f   : > { %s72_s24 = sld [smem:[#allocation3 + %s2547_s8]]  ;;  %p1987_p6 = pneg %p2805_p12 }
  0x40   : > { %s73_s28 = sld [smem:[#allocation3 + %s3895_s16]] }
  0x41   : > { %s3897_s0 = scalar_select %p2793_p10, 1, 0 }
  0x42   : > { %s2830_s29 = sld [smem:[#allocation3 + %s2547_s8]] }
  0x43   : > { %3898 = sst [smem:[#allocation66_spill]] %s3897_s0  ;;  %s3902_s2 = sld [smem:[#allocation79_spill]] }
  0x44   : > { %s1653_s0 = scalar_select %p2786_p8, [#allocation3], [#allocation20] }
  0x46   : > { %s74_s10 = ssub.s32 %s72_s24, %s73_s28  ;;  %s4089_s0 = smov (!%p3821_p9, %s1653_s0), [#allocation28] }
  0x47   : > { %p75_p11 = scmp.eq.s32.totalorder %s74_s10, 0  ;;  %s369_s28 = sshll.u32 %s361_s9, 4  ;;  %s2822_s28 = int_to_ptr.vmem [resolvable:$true] %s369_s28 }
  0x48   : > { %s1654_s24 = scalar_select %p2786_p8, %s2547_s8, 0 }
  0x49   : > { %s2810_s22 = scalar_select %p75_p11, %s2531_s7, %s77_s30  }
  0x4a   : > { %s4091_s24 = smov (!%p3821_p9, %s1654_s24), 0  ;;  %s1990_s5 = scalar_lea.hbm %s3902_s2, 4096 }
  0x4b   : > { %3900 = sst [smem:[#allocation67_spill]] %s2810_s22 }
  0x4c   : > { %s362_s10 = sld [smem:[%s4089_s0 + %s4091_s24]] }
  0x4d   : > { %s3901_s30 = scalar_select %p2825_p1, 1, 0 }
  0x4e   : > { %s2833_s22 = sld [smem:[#allocation3 + %s3895_s16]] }
  0x52   : > { %s1362_s7 = sshll.u32 %s362_s10, 11 }
  0x53   : > { %s2839_s9 = scalar_lea.hbm %s3902_s2, %s1362_s7 }
  0x54   : > { %s1985_s24 = scalar_lea.hbm %s2839_s9, 2048  ;;  %p1991_p13 = scmp.lt.u32.totalorder %s2839_s9, %s3902_s2 }
  0x55   : > { %p1986_p5 = scmp.ne.s32.totalorder %s2839_s9, %s1985_s24  ;;  %p1992_p0 = scmp.lt.u32.totalorder %s1990_s5, %s1985_s24 }
  0x56   : > { %p1994_p9 = scmp.lt.u32.totalorder %s1985_s24, %s2839_s9 }
  0x57   : > { %p1988_p8 = pnand %p1987_p6, %p1986_p5  ;;  %p1993_p7 = por %p1992_p0, %p1991_p13 }
  0x59   : > { %p1989_p11 = pneg %p1988_p8  ;;  %p1995_p4 = por %p1994_p9, %p1993_p7 }
  0x5b   : > { %p1996_p2 = pnand %p1995_p4, %p1989_p11 }
  0x5d   : > { %1999 = shalt.err (!%p1996_p2)
}
  0x5e   : > { %s2000_s0 = scalar_lea.vmem %s2822_s28, 2048  ;;  %s2550_s21 = smov [#allocation7]  }
  0x5f   : > { %p2001_p5 = scmp.ne.s32.totalorder %s2822_s28, %s2000_s0  ;;  %s2005_s10 = sshll.u32 %s2550_s21, 4  ;;  %s2006_s10 = int_to_ptr.vmem [resolvable:$false] %s2005_s10 }
  0x60   : > { %s2007_s7 = scalar_lea.vmem %s2006_s10, 4096  ;;  %p2008_p10 = scmp.lt.s32.totalorder %s2822_s28, %s2006_s10 }
  0x61   : > { %p2003_p8 = pnand %p2001_p5, %p1987_p6  ;;  %p2009_p13 = scmp.lt.s32.totalorder %s2007_s7, %s2000_s0 }
  0x63   : > { %p2004_p3 = pneg %p2003_p8  ;;  %p2010_p0 = por %p2009_p13, %p2008_p10 }
  0x65   : > { %p2011_p7 = pnand %p2010_p0, %p2004_p3 }
  0x67   : > { %2014 = shalt.err (!%p2011_p7)
}
  0x68   : > { %s3825_s24 = smov 128   ;;  %s3827_s0 = smov 8  }
  0x69   : > { %s3903_s5 = scalar_lea.sflag [#allocation8], %s2798_s14  ;;  %p3904_p3 = scmp.eq.s32.totalorder %s2547_s8, 0 }
  0x6a   : > { %1696 = dma.hbm_to_vmem [thread:$0]  (!%p2805_p12), %s2839_s9, 2048, %s2822_s28, %s3903_s5, %s3825_s24, %s3825_s24, %s3827_s0  }
  0x6b   : > { %p3905_p4 = scmp.ne.s32.totalorder %s2507_s19, %s2503_s18  ;;  %p146_p10 = scmp.ne.s32.totalorder %s2503_s18, %s3875_s17 }
  0x6c   : > { %s399_s15 = sand.u32 1, %s2507_s19   ;;  %s130_s21 = ssub.s32 %s2830_s29, %s2833_s22 }
  0x6d   : > { %p142_p9 = por %p3905_p4, %p3904_p3  ;;  %p3906_p2 = scmp.eq.s32.totalorder %s2770_s23, 0 }
  0x6e   : > { %p131_p11 = scmp.eq.s32.totalorder %s130_s21, 0  ;;  %s1335_s20 = sshll.u32 %s399_s15, 7 }
  0x6f   : > { %p2886_p6 = por %p146_p10, %p3906_p2  ;;  %p3908_p5 = scmp.lt.s32.totalorder %s2547_s8, 2 }
  0x70   : > { %s3910_s17 = sadd.s32 1, %s2507_s19  ;;  %s401_s7 = scalar_lea.vmem [#allocation10], %s1335_s20 }
  0x71   : > { %s3907_s10 = scalar_select %p2886_p6, 1, 0 }
  0x72   : > { %p2892_p12 = pnand %p3908_p5, %p142_p9  ;;  %p3912_p8 = pmov %p3908_p5 }
  0x73   : > { %s2899_s9 = scalar_select %p131_p11, %s2507_s19, %s3910_s17  }
  0x74   : > { %s1659_s22 = scalar_select %p142_p9, [#allocation3], [#allocation22] }
  0x75   : > { %3911 = sst [smem:[#allocation68_spill]] %s2899_s9  ;;  %p3913_p13 = pmov %p3908_p5 }
  0x76   : > { %s1660_s29 = scalar_select %p142_p9, %s2547_s8, 0 }
  0x77   : > { %s4093_s22 = smov (!%p3912_p8, %s1659_s22), [#allocation30]  ;;  %s409_s5 = sshll.u32 %s401_s7, 4  ;;  %s2906_s5 = int_to_ptr.vmem [resolvable:$true] %s409_s5 }
  0x78   : > { %s4095_s29 = smov (!%p3913_p13, %s1660_s29), 0  ;;  %s2909_s21 = sld [smem:[#allocation3 + %s2547_s8]] }
  0x79   : > { %s402_s15 = sld [smem:[%s4093_s22 + %s4095_s29]]  ;;  %p196_p0 = scmp.ne.s32.totalorder %s2483_s13, %s2479_s12 }
  0x7a   : > { %s2912_s24 = sld [smem:[#allocation3 + %s3895_s16]]  ;;  %s3831_s22 = scalar_lea.sflag [#allocation11], %s2798_s14 }
  0x7b   : > { %s3914_s4 = sld [smem:[#allocation81_spill]]  ;;  %p2926_p4 = por %p196_p0, %p3904_p3 }
  0x7c   : > { %p2017_p10 = pneg %p2892_p12 }
  0x7f   : > { %s1363_s0 = sshll.u32 %s402_s15, 11 }
  0x81   : > { %s2922_s19 = scalar_lea.hbm %s3914_s4, %s1363_s0  ;;  %s2020_s9 = scalar_lea.hbm %s3914_s4, 4096 }
  0x82   : > { %s2015_s29 = scalar_lea.hbm %s2922_s19, 2048  ;;  %p2021_p5 = scmp.lt.u32.totalorder %s2922_s19, %s3914_s4 }
  0x83   : > { %p2016_p9 = scmp.ne.s32.totalorder %s2922_s19, %s2015_s29  ;;  %p2022_p8 = scmp.lt.u32.totalorder %s2020_s9, %s2015_s29 }
  0x84   : > { %p2024_p0 = scmp.lt.u32.totalorder %s2015_s29, %s2922_s19 }
  0x85   : > { %p2018_p2 = pnand %p2017_p10, %p2016_p9  ;;  %p2023_p13 = por %p2022_p8, %p2021_p5 }
  0x87   : > { %p2019_p11 = pneg %p2018_p2  ;;  %p2025_p3 = por %p2024_p0, %p2023_p13 }
  0x89   : > { %p2026_p7 = pnand %p2025_p3, %p2019_p11 }
  0x8b   : > { %2029 = shalt.err (!%p2026_p7)
}
  0x8c   : > { %s2030_s17 = scalar_lea.vmem %s2906_s5, 2048  ;;  %s2553_s2 = smov [#allocation10]  }
  0x8d   : > { %p2031_p9 = scmp.ne.s32.totalorder %s2906_s5, %s2030_s17  ;;  %s2035_s0 = sshll.u32 %s2553_s2, 4  ;;  %s2036_s0 = int_to_ptr.vmem [resolvable:$false] %s2035_s0 }
  0x8e   : > { %s2037_s7 = scalar_lea.vmem %s2036_s0, 4096  ;;  %p2038_p1 = scmp.lt.s32.totalorder %s2906_s5, %s2036_s0 }
  0x8f   : > { %p2033_p2 = pnand %p2031_p9, %p2017_p10  ;;  %p2039_p5 = scmp.lt.s32.totalorder %s2037_s7, %s2030_s17 }
  0x91   : > { %p2034_p6 = pneg %p2033_p2  ;;  %p2040_p8 = por %p2039_p5, %p2038_p1 }
  0x93   : > { %p2041_p13 = pnand %p2040_p8, %p2034_p6 }
  0x95   : > { %2044 = shalt.err (!%p2041_p13)
}
  0x96   : > { %s3916_s29 = smov 8   ;;  %s3917_s9 = smov 128  }
  0x97   : > { %1706 = dma.hbm_to_vmem [thread:$0]  (!%p2892_p12), %s2922_s19, 2048, %s2906_s5, %s3831_s22, %s3917_s9, %s3917_s9, %s3916_s29  }
  0x98   : > { %p3918_p1 = scmp.eq.s32.totalorder %s2770_s23, 0  ;;  %p3919_p6 = scmp.ne.s32.totalorder %s2479_s12, %s2475_s11 }
  0x99   : > { %s186_s17 = ssub.s32 %s2909_s21, %s2912_s24  ;;  %s439_s15 = sand.u32 1, %s2483_s13  }
  0x9a   : > { %p2966_p7 = por %p3919_p6, %p3918_p1  ;;  %p187_p10 = scmp.eq.s32.totalorder %s186_s17, 0 }
  0x9b   : > { %s1339_s2 = sshll.u32 %s439_s15, 7  ;;  %p3921_p11 = scmp.lt.s32.totalorder %s2547_s8, 2 }
  0x9c   : > { %s3920_s28 = scalar_select %p2966_p7, 1, 0 }
  0x9d   : > { %p2977_p12 = pnand %p3921_p11, %p2926_p4  ;;  %s3923_s11 = sadd.s32 1, %s2483_s13 }
  0x9e   : > { %s2984_s5 = scalar_select %p187_p10, %s2483_s13, %s3923_s11  }
  0x9f   : > { %s1665_s24 = scalar_select %p2926_p4, [#allocation3], [#allocation24] }
  0xa0   : > { %3924 = sst [smem:[#allocation69_spill]] %s2984_s5  ;;  %p3925_p0 = pmov %p3921_p11 }
  0xa1   : > { %s1666_s21 = scalar_select %p2926_p4, %s2547_s8, 0 }
  0xa2   : > { %s4097_s24 = smov (!%p3925_p0, %s1665_s24), [#allocation32]  ;;  %p3926_p3 = pmov %p3925_p0 }
  0xa3   : > { %s441_s0 = scalar_lea.vmem [#allocation13], %s1339_s2  ;;  %s2998_s15 = sld [smem:[#allocation3 + %s2547_s8]] }
  0xa4   : > { %s4099_s21 = smov (!%p3926_p3, %s1666_s21), 0  ;;  %s449_s7 = sshll.u32 %s441_s0, 4  ;;  %s2995_s7 = int_to_ptr.vmem [resolvable:$true] %s449_s7 }
  0xa5   : > { %s442_s17 = sld [smem:[%s4097_s24 + %s4099_s21]]  ;;  %p252_p9 = scmp.ne.s32.totalorder %s2459_s27, %s2455_s26 }
  0xa6   : > { %s3001_s11 = sld [smem:[#allocation3 + %s3895_s16]]  ;;  %p3928_p4 = scmp.eq.s32.totalorder %s2547_s8, 0 }
  0xa7   : > { %s3927_s6 = sld [smem:[#allocation83_spill]]  ;;  %s3834_s24 = scalar_lea.sflag [#allocation14], %s2798_s14 }
  0xa8   : > { %p3015_p5 = por %p252_p9, %p3928_p4  ;;  %p2047_p13 = pneg %p2977_p12 }
  0xab   : > { %s1364_s20 = sshll.u32 %s442_s17, 11 }
  0xad   : > { %s3011_s13 = scalar_lea.hbm %s3927_s6, %s1364_s20  ;;  %s2050_s0 = scalar_lea.hbm %s3927_s6, 4096 }
  0xae   : > { %s2045_s21 = scalar_lea.hbm %s3011_s13, 2048  ;;  %p2051_p10 = scmp.lt.u32.totalorder %s3011_s13, %s3927_s6 }
  0xaf   : > { %p2046_p8 = scmp.ne.s32.totalorder %s3011_s13, %s2045_s21  ;;  %p2052_p11 = scmp.lt.u32.totalorder %s2050_s0, %s2045_s21 }
  0xb0   : > { %p2054_p3 = scmp.lt.u32.totalorder %s2045_s21, %s3011_s13 }
  0xb1   : > { %p2048_p1 = pnand %p2047_p13, %p2046_p8  ;;  %p2053_p0 = por %p2052_p11, %p2051_p10 }
  0xb3   : > { %p2049_p6 = pneg %p2048_p1  ;;  %p2055_p9 = por %p2054_p3, %p2053_p0 }
  0xb5   : > { %p2056_p4 = pnand %p2055_p9, %p2049_p6 }
  0xb7   : > { %2059 = shalt.err (!%p2056_p4)
}
  0xb8   : > { %s2060_s22 = scalar_lea.vmem %s2995_s7, 2048  ;;  %s2554_s4 = smov [#allocation13]  }
  0xb9   : > { %p2061_p8 = scmp.ne.s32.totalorder %s2995_s7, %s2060_s22  ;;  %s2065_s5 = sshll.u32 %s2554_s4, 4  ;;  %s2066_s5 = int_to_ptr.vmem [resolvable:$false] %s2065_s5 }
  0xba   : > { %s2067_s17 = scalar_lea.vmem %s2066_s5, 4096  ;;  %p2068_p7 = scmp.lt.s32.totalorder %s2995_s7, %s2066_s5 }
  0xbb   : > { %p2063_p1 = pnand %p2061_p8, %p2047_p13  ;;  %p2069_p10 = scmp.lt.s32.totalorder %s2067_s17, %s2060_s22 }
  0xbd   : > { %p2064_p2 = pneg %p2063_p1  ;;  %p2070_p11 = por %p2069_p10, %p2068_p7 }
  0xbf   : > { %p2071_p0 = pnand %p2070_p11, %p2064_p2 }
  0xc1   : > { %2074 = shalt.err (!%p2071_p0)
}
  0xc2   : > { %1716 = dma.hbm_to_vmem [thread:$0]  (!%p2977_p12), %s3011_s13, 2048, %s2995_s7, %s3834_s24, %s3917_s9, %s3917_s9, %s3916_s29  }
  0xc3   : > { %p3930_p7 = scmp.eq.s32.totalorder %s2770_s23, 0  ;;  %p3931_p2 = scmp.ne.s32.totalorder %s2455_s26, %s2451_s25 }
  0xc4   : > { %s242_s19 = ssub.s32 %s2998_s15, %s3001_s11  ;;  %s479_s21 = sand.u32 1, %s2459_s27  }
  0xc5   : > { %p3055_p13 = por %p3931_p2, %p3930_p7  ;;  %p243_p6 = scmp.eq.s32.totalorder %s242_s19, 0 }
  0xc6   : > { %s1671_s0 = scalar_select %p3015_p5, [#allocation3], [#allocation26] }
  0xc7   : > { %s3932_s22 = scalar_select %p3055_p13, 1, 0 }
  0xc8   : > { %s3934_s20 = sadd.s32 1, %s2459_s27  ;;  %p3936_p12 = scmp.lt.s32.totalorder %s2547_s8, 2 }
  0xc9   : > { %3933 = sst [smem:[#allocation70_spill]] %s3932_s22  ;;  %s480_s13 = scalar_lea.vmem [#allocation16], %s479_s21 }
  0xca   : > { %s3067_s4 = scalar_select %p243_p6, %s2459_s27, %s3934_s20  }
  0xcb   : > { %s1672_s25 = scalar_select %p3015_p5, %s2547_s8, 0 }
  0xcc   : > { %3935 = sst [smem:[#allocation71_spill]] %s3067_s4  ;;  %s4101_s0 = smov (!%p3936_p12, %s1671_s0), [#allocation34] }
  0xcd   : > { %p3937_p3 = pmov %p3936_p12  ;;  %s488_s7 = sshll.u32 %s480_s13, 4  ;;  %s3084_s7 = int_to_ptr.vmem [resolvable:$true] %s488_s7 }
  0xce   : > { %s1325_s5 = sadd.s32 4294967294, %s2547_s8   ;;  %s46_s17 = ssub.s32 %s2547_s8, %s3895_s16 }
  0xcf   : > { %s4103_s25 = smov (!%p3937_p3, %s1672_s25), 0  ;;  %p3938_p9 = pmov %p3937_p3 }
  0xd0   : > { %s481_s11 = sld [smem:[%s4101_s0 + %s4103_s25]]  ;;  %s49_s19 = sadd.s32 1, %s2543_s1 }
  0xd1   : > { %p3080_p4 = pnand %p3938_p9, %p3015_p5  ;;  %p3090_p8 = scmp.eq.s32.totalorder %s46_s17, 0 }
  0xd2   : > { %s3941_s13 = sld [smem:[#allocation85_spill]]  ;;  %s3836_s0 = scalar_lea.sflag [#allocation17], %s2798_s14 }
  0xd3   : > { %p2077_p10 = pneg %p3080_p4 }
  0xd6   : > { %s1343_s20 = sshll.u32 %s481_s11, 4 }
  0xd8   : > { %s3942_s6 = smov %s3941_s13  ;;  %s3097_s4 = scalar_lea.hbm %s3941_s13, %s1343_s20 }
  0xd9   : > { %s2075_s25 = scalar_lea.hbm %s3097_s4, 16  ;;  %s2080_s21 = scalar_lea.hbm %s3942_s6, 32 }
  0xda   : > { %p2076_p1 = scmp.ne.s32.totalorder %s3097_s4, %s2075_s25  ;;  %p2081_p7 = scmp.lt.u32.totalorder %s3097_s4, %s3942_s6 }
  0xdb   : > { %p2082_p2 = scmp.lt.u32.totalorder %s2080_s21, %s2075_s25  ;;  %p2084_p12 = scmp.lt.u32.totalorder %s2075_s25, %s3097_s4 }
  0xdc   : > { %p2078_p11 = pnand %p2077_p10, %p2076_p1 }
  0xdd   : > { %p2083_p6 = por %p2082_p2, %p2081_p7 }
  0xde   : > { %p2079_p0 = pneg %p2078_p11 }
  0xdf   : > { %p2085_p3 = por %p2084_p12, %p2083_p6 }
  0xe1   : > { %p2086_p9 = pnand %p2085_p3, %p2079_p0 }
  0xe3   : > { %2089 = shalt.err (!%p2086_p9)
}
  0xe4   : > { %s2090_s13 = scalar_lea.vmem %s3084_s7, 16  ;;  %s2555_s11 = smov [#allocation16]  }
  0xe5   : > { %p2091_p1 = scmp.ne.s32.totalorder %s3084_s7, %s2090_s13  ;;  %s2095_s17 = sshll.u32 %s2555_s11, 4  ;;  %s2096_s17 = int_to_ptr.vmem [resolvable:$false] %s2095_s17 }
  0xe6   : > { %s2097_s20 = scalar_lea.vmem %s2096_s17, 32  ;;  %p2098_p13 = scmp.lt.s32.totalorder %s3084_s7, %s2096_s17 }
  0xe7   : > { %p2093_p11 = pnand %p2091_p1, %p2077_p10  ;;  %p2099_p7 = scmp.lt.s32.totalorder %s2097_s20, %s2090_s13 }
  0xe9   : > { %p2094_p5 = pneg %p2093_p11  ;;  %p2100_p2 = por %p2099_p7, %p2098_p13 }
  0xeb   : > { %p2101_p6 = pnand %p2100_p2, %p2094_p5 }
  0xed   : > { %2104 = shalt.err (!%p2101_p6)
}
  0xee   : > { %s3943_s25 = sld [smem:[#allocation64_spill]]  ;;  %p3945_p13 = scmp.ne.s32.totalorder %s2543_s1, %s2539_s3 }
  0xef   : > { %1726 = dma.hbm_to_vmem [thread:$0]  (!%p3080_p4), %s3097_s4, 16, %s3084_s7, %s3836_s0  }
  0xf0   : > { %s3134_s15 = scalar_select %p3090_p8, %s2543_s1, %s49_s19  }
  0xf1   : > { %p3946_p5 = scmp.eq.s32.totalorder %s2547_s8, 0  ;;  %p310_p12 = scmp.eq.s32.totalorder %s2770_s23, 1 }
  0xf2   : > { %3944 = sst [smem:[#allocation72_spill]] %s3134_s15  ;;  %p316_p3 = scmp.eq.s32.totalorder %s1325_s5, 1 }
  0xf3   : > { %p3141_p10 = por %p3946_p5, %p3945_p13  ;;  %p3948_p9 = scmp.eq.s32.totalorder %s2770_s23, 0 }
  0xf4   : > { %p62_p0 = scmp.ne.s32.totalorder %s2539_s3, %s3943_s25  ;;  %s336_s24 = sand.u32 1, %s2543_s1  }
  0xf5   : > { %p3951_p4 = pmov %p3945_p13  ;;  %s1328_s19 = sshll.u32 %s336_s24, 5 }
  0xf6   : > { %p3152_p1 = por %p3948_p9, %p62_p0  ;;  %p3164_p11 = por %p316_p3, %p62_p0 }
  0xf7   : > { %p3160_p8 = por %p310_p12, %p3951_p4  ;;  %s1361_s13 = sshll.u32 %s2547_s8, 9 }
  0xf8   : > { %s3949_s2 = scalar_select %p3152_p1, 1, 0 }
  0xf9   : > { %s3952_s4 = scalar_select %p3160_p8, 1, 0 }
  0xfa   : > { %3950 = sst [smem:[#allocation73_spill]] %s3949_s2  ;;  %s3956_s5 = sld [smem:[#allocation78_spill]] }
  0xfb   : > { %3953 = sst [smem:[#allocation74_spill]] %s3952_s4  ;;  %s340_s25 = scalar_lea.vmem [#allocation4], %s1328_s19 }
  0xfc   : > { %s3954_s7 = scalar_select %p3164_p11, 1, 0 }
  0xfd   : > { %s347_s6 = sshll.u32 %s340_s25, 4  ;;  %p3958_p7 = scmp.lt.s32.totalorder %s2547_s8, 2  ;;  %s3174_s6 = int_to_ptr.vmem [resolvable:$true] %s347_s6 }
  0xfe   : > { %3955 = sst [smem:[#allocation75_spill]] %s3954_s7  ;;  %s3184_s1 = scalar_lea.sflag [#allocation5], %s336_s24 }
  0xff   : > { %p3180_p2 = pnand %p3958_p7, %p3141_p10 }
 0x100   : > { %s3957_s0 = smov %s3956_s5  ;;  %s3172_s20 = scalar_lea.hbm %s3956_s5, %s1361_s13 }
 0x101   : > { %s2105_s13 = scalar_lea.hbm %s3172_s20, 512  ;;  %p2107_p13 = pneg %p3180_p2 }
 0x102   : > { %p2106_p6 = scmp.ne.s32.totalorder %s3172_s20, %s2105_s13  ;;  %s2110_s21 = scalar_lea.hbm %s3957_s0, 1024 }
 0x103   : > { %p2111_p10 = scmp.lt.u32.totalorder %s3172_s20, %s3957_s0  ;;  %p2112_p12 = scmp.lt.u32.totalorder %s2110_s21, %s2105_s13 }
 0x104   : > { %p2108_p5 = pnand %p2107_p13, %p2106_p6  ;;  %p2114_p9 = scmp.lt.u32.totalorder %s2105_s13, %s3172_s20 }
 0x105   : > { %p2113_p3 = por %p2112_p12, %p2111_p10 }
 0x106   : > { %p2109_p0 = pneg %p2108_p5 }
 0x107   : > { %p2115_p4 = por %p2114_p9, %p2113_p3 }
 0x109   : > { %p2116_p7 = pnand %p2115_p4, %p2109_p0 }
 0x10b   : > { %2119 = shalt.err (!%p2116_p7)
}
 0x10c   : > { %s2120_s24 = scalar_lea.vmem %s3174_s6, 512  ;;  %s2556_s25 = smov [#allocation4]  }
 0x10d   : > { %p2121_p6 = scmp.ne.s32.totalorder %s3174_s6, %s2120_s24  ;;  %s2125_s19 = sshll.u32 %s2556_s25, 4  ;;  %s2126_s19 = int_to_ptr.vmem [resolvable:$false] %s2125_s19 }
 0x10e   : > { %s2127_s11 = scalar_lea.vmem %s2126_s19, 1024  ;;  %p2128_p8 = scmp.lt.s32.totalorder %s3174_s6, %s2126_s19 }
 0x10f   : > { %p2123_p5 = pnand %p2121_p6, %p2107_p13  ;;  %p2129_p10 = scmp.lt.s32.totalorder %s2127_s11, %s2120_s24 }
 0x111   : > { %p2124_p11 = pneg %p2123_p5  ;;  %p2130_p12 = por %p2129_p10, %p2128_p8 }
 0x113   : > { %p2131_p3 = pnand %p2130_p12, %p2124_p11 }
 0x115   : > { %2134 = shalt.err (!%p2131_p3)
}
 0x116   : > { %s3960_s13 = sld [smem:[#allocation60_spill]]  ;;  %s3961_s21 = sld [smem:[#allocation61_spill]] }
 0x117   : > { %s3962_s17 = sld [smem:[#allocation59_spill]]  ;;  %p3963_p13 = scmp.eq.s32.totalorder %s2547_s8, 0 }
 0x118   : > { %1691 = dma.hbm_to_vmem [thread:$0]  (!%p3180_p2), %s3172_s20, 512, %s3174_s6, %s3184_s1, %s3917_s9, %s3917_s9, %s3916_s29  }
 0x119   : > { %s100_s15 = sld [smem:[#allocation3 + %s2547_s8]]  ;;  %p3964_p9 = scmp.eq.s32.totalorder %s2770_s23, 0 }
 0x11a   : > { %s101_s5 = sld [smem:[#allocation3 + %s3895_s16]]  ;;  %p3971_p7 = scmp.lt.s32.totalorder %s2547_s8, 2 }
 0x11b   : > { %s3965_s19 = sld [smem:[#allocation56_spill]]  ;;  %s3966_s11 = sld [smem:[#allocation57_spill]] }
 0x11c   : > { %p112_p8 = scmp.ne.s32.totalorder %s3961_s21, %s3960_s13  ;;  %s105_s24 = sadd.s32 1, %s3961_s21 }
 0x11d   : > { %p118_p11 = scmp.ne.s32.totalorder %s3960_s13, %s3962_s17  ;;  %s381_s25 = sand.u32 1, %s3961_s21  }
 0x11e   : > { %p114_p0 = por %p112_p8, %p3963_p13  ;;  %s3969_s1 = sld [smem:[#allocation55_spill]] }
 0x11f   : > { %p3227_p4 = por %p118_p11, %p3964_p9  ;;  %s382_s9 = scalar_lea.vmem [#allocation9], %s381_s25 }
 0x120   : > { %s1656_s6 = scalar_select %p114_p0, [#allocation3], [#allocation21] }
 0x121   : > { %s3967_s0 = scalar_select %p3227_p4, 1, 0 }
 0x122   : > { %s102_s29 = ssub.s32 %s100_s15, %s101_s5  ;;  %s390_s20 = sshll.u32 %s382_s9, 4  ;;  %s3248_s20 = int_to_ptr.vmem [resolvable:$true] %s390_s20 }
 0x123   : > { %3968 = sst [smem:[#allocation59_spill]] %s3967_s0  ;;  %p103_p2 = scmp.eq.s32.totalorder %s102_s29, 0 }
 0x124   : > { %s1657_s13 = scalar_select %p114_p0, %s2547_s8, 0 }
 0x125   : > { %s4105_s21 = smov (!%p103_p2, %s3961_s21), %s105_s24  ;;  %s4107_s6 = smov (!%p3971_p7, %s1656_s6), [#allocation29] }
 0x126   : > { %3970 = sst [smem:[#allocation76_spill]] %s4105_s21  ;;  %p3972_p6 = pmov %p3971_p7 }
 0x127   : > { %s3246_s5 = sld [smem:[#allocation3 + %s2547_s8]]  ;;  %p168_p12 = scmp.ne.s32.totalorder %s3966_s11, %s3965_s19 }
 0x128   : > { %s4109_s13 = smov (!%p3972_p6, %s1657_s13), 0  ;;  %p3973_p5 = pmov %p3972_p6 }
 0x129   : > { %s383_s15 = sld [smem:[%s4107_s6 + %s4109_s13]]  ;;  %p174_p3 = scmp.ne.s32.totalorder %s3965_s19, %s3969_s1 }
 0x12a   : > { %p3241_p10 = pnand %p3973_p5, %p114_p0  ;;  %s3251_s25 = sld [smem:[#allocation3 + %s3895_s16]] }
 0x12b   : > { %s161_s24 = sadd.s32 1, %s3966_s11  ;;  %p3975_p8 = pmov %p3963_p13 }
 0x12c   : > { %s3977_s4 = sld [smem:[#allocation80_spill]]  ;;  %p3978_p13 = pmov %p3964_p9 }
 0x12d   : > { %p3261_p11 = por %p168_p12, %p3975_p8  ;;  %p2137_p2 = pneg %p3241_p10 }
 0x12e   : > { %p3272_p0 = por %p174_p3, %p3978_p13 }
 0x12f   : > { %s1334_s9 = sshll.u32 %s383_s15, 4 }
 0x130   : > { %s3979_s19 = scalar_select %p3272_p0, 1, 0 }
 0x132   : > { %s3268_s6 = scalar_lea.hbm %s3977_s4, %s1334_s9  ;;  %s2140_s13 = scalar_lea.hbm %s3977_s4, 32 }
 0x133   : > { %s2135_s1 = scalar_lea.hbm %s3268_s6, 16  ;;  %p2141_p5 = scmp.lt.u32.totalorder %s3268_s6, %s3977_s4 }
 0x134   : > { %p2136_p9 = scmp.ne.s32.totalorder %s3268_s6, %s2135_s1  ;;  %p2142_p12 = scmp.lt.u32.totalorder %s2140_s13, %s2135_s1 }
 0x135   : > { %p2144_p8 = scmp.lt.u32.totalorder %s2135_s1, %s3268_s6 }
 0x136   : > { %p2138_p7 = pnand %p2137_p2, %p2136_p9  ;;  %p2143_p3 = por %p2142_p12, %p2141_p5 }
 0x138   : > { %p2139_p6 = pneg %p2138_p7  ;;  %p2145_p13 = por %p2144_p8, %p2143_p3 }
 0x13a   : > { %p2146_p0 = pnand %p2145_p13, %p2139_p6 }
 0x13c   : > { %2149 = shalt.err (!%p2146_p0)
}
 0x13d   : > { %s2150_s29 = scalar_lea.vmem %s3248_s20, 16  ;;  %s2557_s27 = smov [#allocation9]  }
 0x13e   : > { %p2151_p9 = scmp.ne.s32.totalorder %s3248_s20, %s2150_s29  ;;  %s2155_s7 = sshll.u32 %s2557_s27, 4  ;;  %s2156_s7 = int_to_ptr.vmem [resolvable:$false] %s2155_s7 }
 0x13f   : > { %s2157_s15 = scalar_lea.vmem %s2156_s7, 32  ;;  %p2158_p1 = scmp.lt.s32.totalorder %s3248_s20, %s2156_s7 }
 0x140   : > { %p2153_p7 = pnand %p2151_p9, %p2137_p2  ;;  %p2159_p5 = scmp.lt.s32.totalorder %s2157_s15, %s2150_s29 }
 0x142   : > { %p2154_p4 = pneg %p2153_p7  ;;  %p2160_p12 = por %p2159_p5, %p2158_p1 }
 0x144   : > { %p2161_p3 = pnand %p2160_p12, %p2154_p4 }
 0x146   : > { %2164 = shalt.err (!%p2161_p3)
}
 0x147   : > { %s3980_s1 = scalar_lea.sflag [#allocation8], %s2798_s14  ;;  %s3981_s29 = sld [smem:[#allocation52_spill]] }
 0x148   : > { %s3982_s17 = sld [smem:[#allocation53_spill]]  ;;  %s3983_s13 = sld [smem:[#allocation51_spill]] }
 0x149   : > { %1701 = dma.hbm_to_vmem [thread:$0]  (!%p3241_p10), %s3268_s6, 16, %s3248_s20, %s3980_s1  }
 0x14a   : > { %s158_s9 = ssub.s32 %s3246_s5, %s3251_s25  ;;  %p3985_p4 = scmp.lt.s32.totalorder %s2547_s8, 2 }
 0x14b   : > { %p159_p1 = scmp.eq.s32.totalorder %s158_s9, 0  ;;  %s3987_s4 = sand.u32 1, %s3966_s11  }
 0x14c   : > { %s1662_s27 = scalar_select %p3261_p11, [#allocation3], [#allocation23] }
 0x14d   : > { %s3310_s7 = scalar_select %p159_p1, %s3966_s11, %s161_s24  }
 0x14e   : > { %s1663_s15 = scalar_select %p3261_p11, %s2547_s8, 0 }
 0x14f   : > { %3984 = sst [smem:[#allocation77_spill]] %s3310_s7  ;;  %s4111_s27 = smov (!%p3985_p4, %s1662_s27), [#allocation31] }
 0x150   : > { %p3986_p0 = pmov %p3985_p4  ;;  %s422_s22 = scalar_lea.vmem [#allocation12], %s3987_s4 }
 0x151   : > { %s430_s20 = sshll.u32 %s422_s22, 4  ;;  %s3330_s24 = sld [smem:[#allocation3 + %s2547_s8]]  ;;  %s3332_s20 = int_to_ptr.vmem [resolvable:$true] %s430_s20 }
 0x152   : > { %s4113_s15 = smov (!%p3986_p0, %s1663_s15), 0  ;;  %p3988_p10 = pmov %p3986_p0 }
 0x153   : > { %s423_s25 = sld [smem:[%s4111_s27 + %s4113_s15]]  ;;  %p224_p6 = scmp.ne.s32.totalorder %s3982_s17, %s3981_s29 }
 0x154   : > { %p3325_p2 = pnand %p3988_p10, %p3261_p11  ;;  %s3335_s6 = sld [smem:[#allocation3 + %s3895_s16]] }
 0x155   : > { %s3990_s1 = sld [smem:[#allocation82_spill]]  ;;  %p3992_p11 = scmp.eq.s32.totalorder %s2547_s8, 0 }
 0x156   : > { %p2167_p7 = pneg %p3325_p2 }
 0x157   : > { %p3349_p13 = por %p224_p6, %p3992_p11 }
 0x159   : > { %s1338_s11 = sshll.u32 %s423_s25, 4 }
 0x15b   : > { %s3991_s0 = smov %s3990_s1  ;;  %s3345_s9 = scalar_lea.hbm %s3990_s1, %s1338_s11 }
 0x15c   : > { %s2165_s15 = scalar_lea.hbm %s3345_s9, 16  ;;  %s2170_s22 = scalar_lea.hbm %s3991_s0, 32 }
 0x15d   : > { %p2166_p9 = scmp.ne.s32.totalorder %s3345_s9, %s2165_s15  ;;  %p2171_p3 = scmp.lt.u32.totalorder %s3345_s9, %s3991_s0 }
 0x15e   : > { %p2172_p1 = scmp.lt.u32.totalorder %s2170_s22, %s2165_s15  ;;  %p2174_p0 = scmp.lt.u32.totalorder %s2165_s15, %s3345_s9 }
 0x15f   : > { %p2168_p5 = pnand %p2167_p7, %p2166_p9 }
 0x160   : > { %p2173_p4 = por %p2172_p1, %p2171_p3 }
 0x161   : > { %p2169_p12 = pneg %p2168_p5 }
 0x162   : > { %p2175_p10 = por %p2174_p0, %p2173_p4 }
 0x164   : > { %p2176_p6 = pnand %p2175_p10, %p2169_p12 }
 0x166   : > { %2179 = shalt.err (!%p2176_p6)
}
 0x167   : > { %s2180_s4 = scalar_lea.vmem %s3332_s20, 16  ;;  %s2558_s25 = smov [#allocation12]  }
 0x168   : > { %p2181_p11 = scmp.ne.s32.totalorder %s3332_s20, %s2180_s4  ;;  %s2185_s11 = sshll.u32 %s2558_s25, 4  ;;  %s2186_s11 = int_to_ptr.vmem [resolvable:$false] %s2185_s11 }
 0x169   : > { %s2187_s21 = scalar_lea.vmem %s2186_s11, 32  ;;  %p2188_p8 = scmp.lt.s32.totalorder %s3332_s20, %s2186_s11 }
 0x16a   : > { %p2183_p9 = pnand %p2181_p11, %p2167_p7  ;;  %p2189_p3 = scmp.lt.s32.totalorder %s2187_s21, %s2180_s4 }
 0x16c   : > { %p2184_p5 = pneg %p2183_p9  ;;  %p2190_p1 = por %p2189_p3, %p2188_p8 }
 0x16e   : > { %p2191_p4 = pnand %p2190_p1, %p2184_p5 }
 0x170   : > { %2194 = shalt.err (!%p2191_p4)
}
 0x171   : > { %s3994_s15 = scalar_lea.sflag [#allocation11], %s2798_s14  ;;  %p3995_p8 = scmp.eq.s32.totalorder %s2770_s23, 0 }
 0x172   : > { %1711 = dma.hbm_to_vmem [thread:$0]  (!%p3325_p2), %s3345_s9, 16, %s3332_s20, %s3994_s15  }
 0x173   : > { %p3996_p7 = scmp.ne.s32.totalorder %s3981_s29, %s3983_s13  ;;  %s3998_s4 = sld [smem:[#allocation48_spill]] }
 0x174   : > { %s3999_s22 = sld [smem:[#allocation49_spill]]  ;;  %s214_s1 = ssub.s32 %s3330_s24, %s3335_s6 }
 0x175   : > { %p3385_p12 = por %p3996_p7, %p3995_p8  ;;  %s4000_s25 = sld [smem:[#allocation47_spill]] }
 0x176   : > { %s217_s11 = sadd.s32 1, %s3982_s17  ;;  %p215_p0 = scmp.eq.s32.totalorder %s214_s1, 0 }
 0x177   : > { %s3997_s5 = scalar_select %p3385_p12, 1, 0 }
 0x178   : > { %s4001_s21 = sand.u32 1, %s3982_s17   ;;  %s4115_s17 = smov (!%p215_p0, %s3982_s17), %s217_s11 }
 0x179   : > { %s462_s0 = scalar_lea.vmem [#allocation15], %s4001_s21  ;;  %4002 = sst [smem:[#allocation47_spill]] %s4115_s17 }
 0x17a   : > { %s470_s7 = sshll.u32 %s462_s0, 4  ;;  %p4003_p2 = scmp.lt.s32.totalorder %s2547_s8, 2  ;;  %s3417_s7 = int_to_ptr.vmem [resolvable:$true] %s470_s7 }
 0x17b   : > { %s1668_s20 = scalar_select %p3349_p13, [#allocation3], [#allocation25] }
 0x17c   : > { %s1669_s29 = scalar_select %p3349_p13, %s2547_s8, 0 }
 0x17d   : > { %s4117_s20 = smov (!%p4003_p2, %s1668_s20), [#allocation33]  ;;  %p4004_p10 = pmov %p4003_p2 }
 0x17e   : > { %p4005_p6 = pmov %p4003_p2  ;;  %s3415_s0 = sld [smem:[#allocation3 + %s2547_s8]] }
 0x17f   : > { %s4119_s29 = smov (!%p4004_p10, %s1669_s29), 0  ;;  %s3420_s6 = sld [smem:[#allocation3 + %s3895_s16]] }
 0x180   : > { %p3410_p11 = pnand %p4005_p6, %p3349_p13  ;;  %s463_s24 = sld [smem:[%s4117_s20 + %s4119_s29]] }
 0x181   : > { %p280_p9 = scmp.ne.s32.totalorder %s3999_s22, %s3998_s4  ;;  %s4007_s27 = sld [smem:[#allocation84_spill]] }
 0x182   : > { %p4009_p13 = scmp.eq.s32.totalorder %s2547_s8, 0  ;;  %p2197_p4 = pneg %p3410_p11 }
 0x184   : > { %p3433_p3 = por %p280_p9, %p4009_p13 }
 0x186   : > { %s1342_s9 = sshll.u32 %s463_s24, 4 }
 0x187   : > { %s4008_s2 = smov %s4007_s27  ;;  %s3429_s11 = scalar_lea.hbm %s4007_s27, %s1342_s9 }
 0x188   : > { %s2195_s20 = scalar_lea.hbm %s3429_s11, 16  ;;  %s2200_s9 = scalar_lea.hbm %s4008_s2, 32 }
 0x189   : > { %p2196_p1 = scmp.ne.s32.totalorder %s3429_s11, %s2195_s20  ;;  %p2201_p0 = scmp.lt.u32.totalorder %s3429_s11, %s4008_s2 }
 0x18a   : > { %p2202_p2 = scmp.lt.u32.totalorder %s2200_s9, %s2195_s20  ;;  %p2204_p6 = scmp.lt.u32.totalorder %s2195_s20, %s3429_s11 }
 0x18b   : > { %p2198_p8 = pnand %p2197_p4, %p2196_p1 }
 0x18c   : > { %p2203_p10 = por %p2202_p2, %p2201_p0 }
 0x18d   : > { %p2199_p7 = pneg %p2198_p8 }
 0x18e   : > { %p2205_p9 = por %p2204_p6, %p2203_p10 }
 0x190   : > { %p2206_p13 = pnand %p2205_p9, %p2199_p7 }
 0x192   : > { %2209 = shalt.err (!%p2206_p13)
}
 0x193   : > { %s2210_s27 = scalar_lea.vmem %s3417_s7, 16  ;;  %s2559_s29 = smov [#allocation15]  }
 0x194   : > { %p2211_p1 = scmp.ne.s32.totalorder %s3417_s7, %s2210_s27  ;;  %s2215_s24 = sshll.u32 %s2559_s29, 4  ;;  %s2216_s24 = int_to_ptr.vmem [resolvable:$false] %s2215_s24 }
 0x195   : > { %s2217_s15 = scalar_lea.vmem %s2216_s24, 32  ;;  %p2218_p12 = scmp.lt.s32.totalorder %s3417_s7, %s2216_s24 }
 0x196   : > { %p2213_p8 = pnand %p2211_p1, %p2197_p4  ;;  %p2219_p0 = scmp.lt.s32.totalorder %s2217_s15, %s2210_s27 }
 0x198   : > { %p2214_p5 = pneg %p2213_p8  ;;  %p2220_p2 = por %p2219_p0, %p2218_p12 }
 0x19a   : > { %p2221_p10 = pnand %p2220_p2, %p2214_p5 }
 0x19c   : > { %2224 = shalt.err (!%p2221_p10)
}
 0x19d   : > { %s4011_s20 = scalar_lea.sflag [#allocation14], %s2798_s14  ;;  %p4012_p12 = scmp.eq.s32.totalorder %s2770_s23, 0 }
 0x19e   : > { %1721 = dma.hbm_to_vmem [thread:$0]  (!%p3410_p11), %s3429_s11, 16, %s3417_s7, %s4011_s20  }
 0x19f   : > { %p4013_p5 = scmp.ne.s32.totalorder %s3998_s4, %s4000_s25  ;;  %s270_s9 = ssub.s32 %s3415_s0, %s3420_s6 }
 0x1a0   : > { %s273_s1 = sadd.s32 1, %s3999_s22  ;;  %p271_p7 = scmp.eq.s32.totalorder %s270_s9, 0 }
 0x1a1   : > { %p3469_p4 = por %p4013_p5, %p4012_p12  ;;  %s497_s27 = sand.u32 1, %s3999_s22  }
 0x1a2   : > { %s1674_s29 = scalar_select %p3433_p3, [#allocation3], [#allocation27] }
 0x1a3   : > { %s4121_s22 = smov (!%p271_p7, %s3999_s22), %s273_s1  ;;  %p4015_p6 = scmp.lt.s32.totalorder %s2547_s8, 2 }
 0x1a4   : > { %s1675_s24 = scalar_select %p3433_p3, %s2547_s8, 0 }
 0x1a5   : > { %s4123_s29 = smov (!%p4015_p6, %s1674_s29), [#allocation35]  ;;  %p4016_p9 = pmov %p4015_p6 }
 0x1a6   : > { %p4017_p11 = pmov %p4015_p6  ;;  %s498_s25 = scalar_lea.vmem [#allocation18], %s497_s27 }
 0x1a7   : > { %s4125_s24 = smov (!%p4016_p9, %s1675_s24), 0  ;;  %s506_s0 = sshll.u32 %s498_s25, 4  ;;  %s3497_s0 = int_to_ptr.vmem [resolvable:$true] %s506_s0 }
 0x1a8   : > { %p3493_p13 = pnand %p4017_p11, %p3433_p3  ;;  %s499_s4 = sld [smem:[%s4123_s29 + %s4125_s24]] }
 0x1a9   : > { %s4019_s20 = sld [smem:[#allocation86_spill]] }
 0x1aa   : > { %p2227_p8 = pneg %p3493_p13 }
 0x1ae   : > { %s1344_s6 = sshll.u32 %s499_s4, 4 }
 0x1af   : > { %s4020_s2 = smov %s4019_s20  ;;  %s504_s9 = scalar_lea.hbm %s4019_s20, %s1344_s6 }
 0x1b0   : > { %s2225_s1 = scalar_lea.hbm %s504_s9, 16  ;;  %s2230_s27 = scalar_lea.hbm %s4020_s2, 32 }
 0x1b1   : > { %p2226_p1 = scmp.ne.s32.totalorder %s504_s9, %s2225_s1  ;;  %p2231_p2 = scmp.lt.u32.totalorder %s504_s9, %s4020_s2 }
 0x1b2   : > { %p2232_p10 = scmp.lt.u32.totalorder %s2230_s27, %s2225_s1  ;;  %p2234_p5 = scmp.lt.u32.totalorder %s2225_s1, %s504_s9 }
 0x1b3   : > { %p2228_p3 = pnand %p2227_p8, %p2226_p1 }
 0x1b4   : > { %p2233_p12 = por %p2232_p10, %p2231_p2 }
 0x1b5   : > { %p2229_p0 = pneg %p2228_p3 }
 0x1b6   : > { %p2235_p7 = por %p2234_p5, %p2233_p12 }
 0x1b8   : > { %p2236_p6 = pnand %p2235_p7, %p2229_p0 }
 0x1ba   : > { %2239 = shalt.err (!%p2236_p6)
}
 0x1bb   : > { %s2240_s4 = scalar_lea.vmem %s3497_s0, 16  ;;  %s2560_s17 = smov [#allocation18]  }
 0x1bc   : > { %p2241_p9 = scmp.ne.s32.totalorder %s3497_s0, %s2240_s4  ;;  %s2245_s25 = sshll.u32 %s2560_s17, 4  ;;  %s2246_s25 = int_to_ptr.vmem [resolvable:$false] %s2245_s25 }
 0x1bd   : > { %s2247_s6 = scalar_lea.vmem %s2246_s25, 32  ;;  %p2248_p3 = scmp.lt.s32.totalorder %s3497_s0, %s2246_s25 }
 0x1be   : > { %p2243_p11 = pnand %p2241_p9, %p2227_p8  ;;  %p2249_p2 = scmp.lt.s32.totalorder %s2247_s6, %s2240_s4 }
 0x1c0   : > { %p2244_p1 = pneg %p2243_p11  ;;  %p2250_p10 = por %p2249_p2, %p2248_p3 }
 0x1c2   : > { %p2251_p12 = pnand %p2250_p10, %p2244_p1 }
 0x1c4   : > { %2254 = shalt.err (!%p2251_p12)
}
 0x1c5   : > { %s4021_s11 = scalar_lea.sflag [#allocation17], %s2798_s14  ;;  %p4022_p0 = scmp.ne.s32.totalorder %s3901_s30, 0 }
 0x1c6   : > { %1731 = dma.hbm_to_vmem [thread:$0]  (!%p3493_p13), %s504_s9, 16, %s3497_s0, %s4021_s11  }
 0x1c7   : > { %515 = sbr.rel (%p4022_p0) target bundleno = 1548 (0x60c), region = 56  ;;  %s4023_s15 = sld [smem:[#allocation73_spill]] (!%p4022_p0) }
 0x1c8   : > { %s3527_s20 = sand.u32 (!%p4022_p0), 1, %s2539_s3  }
 0x1c9   : > { %s1346_s1 = sshll.u32 (!%p4022_p0), %s3527_s20, 5  ;;  %s518_s21 = scalar_lea.sflag (!%p4022_p0), [#allocation5], %s3527_s20 }
 0x1ca   : > { %s3533_s27 = scalar_lea.vmem (!%p4022_p0), [#allocation4], %s1346_s1 }
 0x1cd   : > { %p4024_p8 = scmp.ne.s32.totalorder (!%p4022_p0), %s4023_s15, 0 }
 0x1cf   : > { %2398 = dma.done.wait (%p4024_p8), %s518_s21, 512  }
 0x1d0   : > { %2400 = vsyncadd (%p4024_p8), %s518_s21, 4294966784  ;;  %s4025_s14 = sld [smem:[#allocation62_spill]]  ;;  %s4026_s30 = sld [smem:[#allocation66_spill]] }
 0x1d1   : > { %s3540_s7 = sand.u32 1, %s2770_s23  }
 0x1d2   : > { %s527_s29 = scalar_lea.sflag [#allocation8], %s3540_s7 }
 0x1d6   : > { %s528_s0 = sand.u32 1, %s4025_s14   ;;  %p4027_p13 = scmp.ne.s32.totalorder %s4026_s30, 0 }
 0x1d7   : > { %s1347_s9 = sshll.u32 %s528_s0, 7 }
 0x1d8   : > { %s3544_s24 = scalar_lea.vmem [#allocation7], %s1347_s9 }
 0x1d9   : > { %2402 = dma.done.wait (%p4027_p13), %s527_s29, 2048  }
 0x1da   : > { %2404 = vsyncadd (%p4027_p13), %s527_s29, 4294965248  ;;  %s4028_s4 = sld [smem:[#allocation60_spill]]  ;;  %s4029_s17 = sld [smem:[#allocation59_spill]] }
 0x1e0   : > { %s537_s25 = sand.u32 1, %s4028_s4   ;;  %p4030_p5 = scmp.ne.s32.totalorder %s4029_s17, 0 }
 0x1e1   : > { %s3551_s6 = scalar_lea.vmem [#allocation9], %s537_s25 }
 0x1e2   : > { %2406 = dma.done.wait (%p4030_p5), %s527_s29, 16  }
 0x1e3   : > { %2408 = vsyncadd (%p4030_p5), %s527_s29, 4294967280  ;;  %s545_s11 = sand.u32 1, %s2503_s18   ;;  %s544_s21 = scalar_lea.sflag [#allocation11], %s3540_s7 }
 0x1e4   : > { %s1348_s15 = sshll.u32 %s545_s11, 7  ;;  %p4031_p7 = scmp.ne.s32.totalorder %s3907_s10, 0 }
 0x1e5   : > { %s3559_s14 = scalar_lea.vmem [#allocation10], %s1348_s15 }
 0x1e6   : > { %2410 = dma.done.wait (%p4031_p7), %s544_s21, 2048  }
 0x1e7   : > { %2412 = vsyncadd (%p4031_p7), %s544_s21, 4294965248  ;;  %s4032_s30 = sld [smem:[#allocation56_spill]]  ;;  %p4033_p6 = scmp.ne.s32.totalorder %s3979_s19, 0 }
 0x1ed   : > { %s554_s0 = sand.u32 1, %s4032_s30  }
 0x1ee   : > { %s3566_s9 = scalar_lea.vmem [#allocation12], %s554_s0 }
 0x1ef   : > { %2414 = dma.done.wait (%p4033_p6), %s544_s21, 16  }
 0x1f0   : > { %2416 = vsyncadd (%p4033_p6), %s544_s21, 4294967280  ;;  %s562_s29 = sand.u32 1, %s2479_s12   ;;  %s561_s17 = scalar_lea.sflag [#allocation14], %s3540_s7 }
 0x1f1   : > { %s1349_s4 = sshll.u32 %s562_s29, 7  ;;  %p4034_p9 = scmp.ne.s32.totalorder %s3920_s28, 0 }
 0x1f2   : > { %s3574_s25 = scalar_lea.vmem [#allocation13], %s1349_s4 }
 0x1f3   : > { %2418 = dma.done.wait (%p4034_p9), %s561_s17, 2048  }
 0x1f4   : > { %2420 = vsyncadd (%p4034_p9), %s561_s17, 4294965248  ;;  %s4035_s10 = sld [smem:[#allocation52_spill]]  ;;  %p4036_p11 = scmp.ne.s32.totalorder %s3997_s5, 0 }
 0x1fa   : > { %s571_s11 = sand.u32 1, %s4035_s10  }
 0x1fb   : > { %s3581_s15 = scalar_lea.vmem [#allocation15], %s571_s11 }
 0x1fc   : > { %2422 = dma.done.wait (%p4036_p11), %s561_s17, 16  }
 0x1fd   : > { %2424 = vsyncadd (%p4036_p11), %s561_s17, 4294967280  ;;  %s4037_s19 = sld [smem:[#allocation70_spill]]  ;;  %s579_s21 = sand.u32 1, %s2455_s26  }
 0x1fe   : > { %s578_s30 = scalar_lea.sflag [#allocation17], %s3540_s7  ;;  %s3589_s0 = scalar_lea.vmem [#allocation16], %s579_s21 }
 0x203   : > { %p4038_p1 = scmp.ne.s32.totalorder %s4037_s19, 0 }
 0x205   : > { %2426 = dma.done.wait (%p4038_p1), %s578_s30, 16  }
 0x206   : > { %2428 = vsyncadd (%p4038_p1), %s578_s30, 4294967280  ;;  %s4039_s28 = sld [smem:[#allocation48_spill]] }
 0x20c   : > { %s587_s29 = sand.u32 1, %s4039_s28  }
 0x20d   : > { %s3596_s4 = scalar_lea.vmem [#allocation18], %s587_s29 }
 0x20e   : > { %2430 = dma.done.wait (%p3469_p4), %s578_s30, 16  }
 0x20f   : > { %2432 = vsyncadd (%p3469_p4), %s578_s30, 4294967280  ;;  %v672_v0 = vld [vmem:[%s3544_s24] sm:$0xff]  ;;  %v673_v1 = vld [vmem:[%s3544_s24 + $0x8] sm:$0xff]  ;;  %s657_s5 = scalar_lea.vmem [#allocation19], %s1346_s1  ;;  %s4040_s13 = sld [smem:[#allocation74_spill]] }
 0x210   : > { %v674_v2 = vld [vmem:[%s3544_s24 + $0x10] sm:$0xff]  ;;  %v1540_v3 = vpack.c.bf16 %v673_v1, %v672_v0  ;;  %v675_v4 = vld [vmem:[%s3544_s24 + $0x18] sm:$0xff]  ;;  %v676_v6 = vld [vmem:[%s3544_s24 + $0x20] sm:$0xff]  ;;  %s1095_s7 = sshll.u32 %s657_s5, 4  ;;  %s1082_s1 = scalar_lea.sflag [#allocation6], %s3527_s20  ;;  %s3671_s7 = int_to_ptr.vmem [resolvable:$true] %s1095_s7 }
 0x211   : > { %v1544_v5 = vpack.c.bf16 %v675_v4, %v674_v2  ;;  %v677_v7 = vld [vmem:[%s3544_s24 + $0x28] sm:$0xff]  ;;  %v668_v9 = vld [vmem:[%s3533_s27] sm:$0xff]  ;;  %v678_v10 = vld [vmem:[%s3544_s24 + $0x30] sm:$0xff]  ;;  %s2255_s17 = scalar_lea.vmem %s3671_s7, 512 }
 0x212   : > { %1541 = vmatprep.subr.bf16.mxu0 %v1540_v3  ;;  %v1548_v8 = vpack.c.bf16 %v677_v7, %v676_v6  ;;  %v679_v11 = vld [vmem:[%s3544_s24 + $0x38] sm:$0xff]  ;;  %1458 = vmatprep.mubr.f32.mxu0 %v668_v9  ;;  %v784_v12 = vld [vmem:[%s3559_s14] sm:$0xff]  ;;  %v785_v13 = vld [vmem:[%s3559_s14 + $0x8] sm:$0xff]  ;;  %p2256_p4 = scmp.ne.s32.totalorder %s3671_s7, %s2255_s17 }
 0x213   : > { %1543 = vmatpush3.bf16.msra.mxu0 %v1540_v3  ;;  %v786_v14 = vld [vmem:[%s3559_s14 + $0x10] sm:$0xff]  ;;  %v787_v15 = vld [vmem:[%s3559_s14 + $0x18] sm:$0xff]  ;;  %v1572_v16 = vpack.c.bf16 %v785_v13, %v784_v12  ;;  %v1552_v18 = vpack.c.bf16 %v679_v11, %v678_v10  ;;  %v788_v19 = vld [vmem:[%s3559_s14 + $0x20] sm:$0xff] }
 0x214   : > { %1545 = vmatprep.subr.bf16.mxu0 %v1544_v5  ;;  %v1576_v17 = vpack.c.bf16 %v787_v15, %v786_v14  ;;  %v789_v20 = vld [vmem:[%s3559_s14 + $0x28] sm:$0xff]  ;;  %v680_v21 = vld [vmem:[%s3544_s24 + $0x40] sm:$0xff]  ;;  %v790_v25 = vld [vmem:[%s3559_s14 + $0x30] sm:$0xff] }
 0x215   : > { %v681_v22 = vld [vmem:[%s3544_s24 + $0x48] sm:$0xff]  ;;  %1573 = vmatprep.subr.bf16.mxu1 %v1572_v16  ;;  %v1580_v23 = vpack.c.bf16 %v789_v20, %v788_v19  ;;  %v791_v26 = vld [vmem:[%s3559_s14 + $0x38] sm:$0xff]  ;;  %v682_v27 = vld [vmem:[%s3544_s24 + $0x50] sm:$0xff]  ;;  %p4043_p3 = scmp.ne.s32.totalorder %s4040_s13, 0 }
 0x216   : > { %1575 = vmatpush3.bf16.msra.mxu1 %v1572_v16  ;;  %v1556_v24 = vpack.c.bf16 %v681_v22, %v680_v21  ;;  %v683_v28 = vld [vmem:[%s3544_s24 + $0x58] sm:$0xff]  ;;  %v1584_v29 = vpack.c.bf16 %v791_v26, %v790_v25  ;;  %v792_v31 = vld [vmem:[%s3559_s14 + $0x40] sm:$0xff]  ;;  %v793_v32 = vld [vmem:[%s3559_s14 + $0x48] sm:$0xff] }
 0x217   : > { %1547 = vmatpush3.bf16.msra.mxu0 %v1544_v5  ;;  %1577 = vmatprep.subr.bf16.mxu1 %v1576_v17  ;;  %v1560_v30 = vpack.c.bf16 %v683_v28, %v682_v27  ;;  %v684_v33 = vld [vmem:[%s3544_s24 + $0x60] sm:$0xff]  ;;  %v685_v34 = vld [vmem:[%s3544_s24 + $0x68] sm:$0xff]  ;;  %v1588_v35 = vpack.c.bf16 %v793_v32, %v792_v31  ;;  %v794_v37 = vld [vmem:[%s3559_s14 + $0x50] sm:$0xff]  ;;  %p2257_p2 = pnand %p2256_p4, %p4043_p3 }
 0x218   : > { %1549 = vmatprep.subr.bf16.mxu0 %v1548_v8  ;;  %v1564_v36 = vpack.c.bf16 %v685_v34, %v684_v33  ;;  %v795_v38 = vld [vmem:[%s3559_s14 + $0x58] sm:$0xff]  ;;  %v686_v39 = vld [vmem:[%s3544_s24 + $0x70] sm:$0xff]  ;;  %v796_v43 = vld [vmem:[%s3559_s14 + $0x60] sm:$0xff] }
 0x219   : > { %v687_v40 = vld [vmem:[%s3544_s24 + $0x78] sm:$0xff]  ;;  %v1592_v41 = vpack.c.bf16 %v795_v38, %v794_v37  ;;  %v797_v44 = vld [vmem:[%s3559_s14 + $0x68] sm:$0xff]  ;;  %v1351_v9 = vld [vmem:[%s3551_s6] ss:$0 sm:$0xff]  ;;  %p2258_p10 = pneg %p2257_p2 }
 0x21a   : > { %1579 = vmatpush3.bf16.msra.mxu1 %v1576_v17  ;;  %v1568_v42 = vpack.c.bf16 %v687_v40, %v686_v39  ;;  %v1596_v45 = vpack.c.bf16 %v797_v44, %v796_v43  ;;  %v669_v46 = vld [vmem:[%s3533_s27 + $0x8] sm:$0xff]  ;;  %v670_v47 = vld [vmem:[%s3533_s27 + $0x10] sm:$0xff]  ;;  %v671_v48 = vld [vmem:[%s3533_s27 + $0x18] sm:$0xff]  ;;  %s1365_s27 = sshll.u32 %s2770_s23, 9  ;;  %s2561_s23 = smov [#allocation19]  }
 0x21b   : > { %1551 = vmatpush3.bf16.msra.mxu0 %v1548_v8  ;;  %1581 = vmatprep.subr.bf16.mxu1 %v1580_v23  ;;  %v798_v49 = vld [vmem:[%s3559_s14 + $0x70] sm:$0xff]  ;;  %v799_v50 = vld [vmem:[%s3559_s14 + $0x78] sm:$0xff]  ;;  %v896_v52 = vld [vmem:[%s3574_s25] sm:$0xff]  ;;  %s4041_s14 = sld [smem:[#allocation87_spill]] }
 0x21c   : > { %1553 = vmatprep.subr.bf16.mxu0 %v1552_v18  ;;  %v1600_v51 = vpack.c.bf16 %v799_v50, %v798_v49  ;;  %v897_v53 = vld [vmem:[%s3574_s25 + $0x8] sm:$0xff]  ;;  %v898_v54 = vld [vmem:[%s3574_s25 + $0x10] sm:$0xff]  ;;  %v899_v56 = vld [vmem:[%s3574_s25 + $0x18] sm:$0xff] }
 0x21d   : > { %v1604_v55 = vpack.c.bf16 %v897_v53, %v896_v52  ;;  %v1608_v57 = vpack.c.bf16 %v899_v56, %v898_v54  ;;  %v900_v58 = vld [vmem:[%s3574_s25 + $0x20] sm:$0xff]  ;;  %v901_v59 = vld [vmem:[%s3574_s25 + $0x28] sm:$0xff]  ;;  %v902_v61 = vld [vmem:[%s3574_s25 + $0x30] sm:$0xff] }
 0x21e   : > { %1583 = vmatpush3.bf16.msra.mxu1 %v1580_v23  ;;  %v1612_v60 = vpack.c.bf16 %v901_v59, %v900_v58  ;;  %v903_v62 = vld [vmem:[%s3574_s25 + $0x38] sm:$0xff]  ;;  %v904_v0 = vld [vmem:[%s3574_s25 + $0x40] sm:$0xff]  ;;  %v905_v1 = vld [vmem:[%s3574_s25 + $0x48] sm:$0xff] }
 0x21f   : > { %1555 = vmatpush3.bf16.msra.mxu0 %v1552_v18  ;;  %1585 = vmatprep.subr.bf16.mxu1 %v1584_v29  ;;  %v1616_v63 = vpack.c.bf16 %v903_v62, %v902_v61  ;;  %v1620_v2 = vpack.c.bf16 %v905_v1, %v904_v0  ;;  %v906_v3 = vld [vmem:[%s3574_s25 + $0x50] sm:$0xff]  ;;  %v907_v4 = vld [vmem:[%s3574_s25 + $0x58] sm:$0xff]  ;;  %v908_v6 = vld [vmem:[%s3574_s25 + $0x60] sm:$0xff] }
 0x220   : > { %1557 = vmatprep.subr.bf16.mxu0 %v1556_v24  ;;  %v1624_v5 = vpack.c.bf16 %v907_v4, %v906_v3  ;;  %v909_v7 = vld [vmem:[%s3574_s25 + $0x68] sm:$0xff]  ;;  %v910_v22 = vld [vmem:[%s3574_s25 + $0x70] sm:$0xff]  ;;  %v911_v23 = vld [vmem:[%s3574_s25 + $0x78] sm:$0xff]  ;;  %s2259_s25 = sshll.u32 %s2561_s23, 4  ;;  %s2260_s25 = int_to_ptr.vmem [resolvable:$false] %s2259_s25 }
 0x221   : > { %v1628_v8 = vpack.c.bf16 %v909_v7, %v908_v6  ;;  %v1352_v25 = vld [vmem:[%s3566_s9] ss:$0 sm:$0xff]  ;;  %s3669_s9 = scalar_lea.hbm %s4041_s14, %s1365_s27  ;;  %s2261_s10 = scalar_lea.vmem %s2260_s25, 1024 }
 0x222   : > { %1587 = vmatpush3.bf16.msra.mxu1 %v1584_v29  ;;  %v1353_v38 = vld [vmem:[%s3581_s15] ss:$0 sm:$0xff]  ;;  %p2262_p12 = scmp.lt.s32.totalorder %s3671_s7, %s2260_s25  ;;  %p2263_p0 = scmp.lt.s32.totalorder %s2261_s10, %s2255_s17 }
 0x223   : > { %1559 = vmatpush3.bf16.msra.mxu0 %v1556_v24  ;;  %1589 = vmatprep.subr.bf16.mxu1 %v1588_v35  ;;  %v1632_v24 = vpack.c.bf16 %v911_v23, %v910_v22 }
 0x224   : > { %1561 = vmatprep.subr.bf16.mxu0 %v1560_v30  ;;  %p2264_p8 = por %p2263_p0, %p2262_p12 }
 0x226   : > { %1591 = vmatpush3.bf16.msra.mxu1 %v1588_v35  ;;  %p2265_p13 = pnand %p2264_p8, %p2258_p10 }
 0x227   : > { %1563 = vmatpush3.bf16.msra.mxu0 %v1560_v30  ;;  %1593 = vmatprep.subr.bf16.mxu1 %v1592_v41 }
 0x228   : > { %1565 = vmatprep.subr.bf16.mxu0 %v1564_v36 }
 0x22a   : > { %1595 = vmatpush3.bf16.msra.mxu1 %v1592_v41 }
 0x22b   : > { %1567 = vmatpush3.bf16.msra.mxu0 %v1564_v36  ;;  %1597 = vmatprep.subr.bf16.mxu1 %v1596_v45 }
 0x22c   : > { %1569 = vmatprep.subr.bf16.mxu0 %v1568_v42 }
 0x22e   : > { %1599 = vmatpush3.bf16.msra.mxu1 %v1596_v45 }
 0x22f   : > { %1571 = vmatpush3.bf16.msra.mxu0 %v1568_v42  ;;  %1601 = vmatprep.subr.bf16.mxu1 %v1600_v51 }
 0x230   : > { %1605 = vmatprep.subr.bf16.mxu0 %v1604_v55 }
 0x232   : > { %1459 = vmatmul.mubr.f32.vlgmr.msra.gmra.mrb[0].mxu0 %v669_v46  ;;  %1603 = vmatpush3.bf16.msra.mxu1 %v1600_v51 }
 0x233   : > { %1461 = vmatprep.mubr.f32.mxu0 %v670_v47  ;;  %1636 = vmatprep.subr.bf16.mxu1 %v1604_v55  ;;  %v1016_v47 = vlaneseq }
 0x234   : > { %1607 = vmatpush3.bf16.msra.mxu0 %v1604_v55 }
 0x235   : > { %1609 = vmatprep.subr.bf16.mxu0 %v1608_v57 }
 0x236   : > { %1462 = vmatmul.mubr.f32.gmra.mrb[2].mxu0 %v671_v48  ;;  %v1017_v48 = vand.u32 127, %v1016_v47 }
 0x238   : > { %1611 = vmatpush3.bf16.msra.mxu0 %v1608_v57  ;;  %vm1018_vm0 = vcmp.lt.s32.totalorder %v1017_v48, 32 }
 0x239   : > { %1613 = vmatprep.subr.bf16.mxu0 %v1612_v60 }
 0x23c   : > { %1615 = vmatpush3.bf16.msra.mxu0 %v1612_v60 }
 0x23d   : > { %1617 = vmatprep.subr.bf16.mxu0 %v1616_v63 }
 0x240   : > { %1619 = vmatpush3.bf16.msra.mxu0 %v1616_v63 }
 0x241   : > { %1621 = vmatprep.subr.bf16.mxu0 %v1620_v2 }
 0x244   : > { %1623 = vmatpush3.bf16.msra.mxu0 %v1620_v2 }
 0x245   : > { %1625 = vmatprep.subr.bf16.mxu0 %v1624_v5 }
 0x248   : > { %1627 = vmatpush3.bf16.msra.mxu0 %v1624_v5 }
 0x249   : > { %1629 = vmatprep.subr.bf16.mxu0 %v1628_v8 }
 0x24c   : > { %1631 = vmatpush3.bf16.msra.mxu0 %v1628_v8 }
 0x24d   : > { %1633 = vmatprep.subr.bf16.mxu0 %v1632_v24 }
 0x250   : > { %1635 = vmatpush3.bf16.msra.mxu0 %v1632_v24 }
 0x305   : > { %v1460_v10 = vpop.f32.mrb[0].mxu0 }
 0x306   : > { %v767_v11 = vadd.f32 %v1460_v10, %v1351_v9  ;;  %v761_v12 = vpop.f32.mrb[1].mxu0 }
 0x307   : > { %v762_v13 = vadd.f32 %v1351_v9, %v761_v12 }
 0x308   : > { %v781_v16 = vmax.f32 %v767_v11, 0.0 }
 0x309   : > { %v1463_v14 = vpop.f32.mrb[2].mxu0  ;;  %v780_v15 = vmax.f32 %v762_v13, 0.0 }
 0x30a   : > { %v777_v17 = vadd.f32 %v1463_v14, %v1351_v9  ;;  %v771_v18 = vpop.f32.mrb[3].mxu0 }
 0x30b   : > { %v772_v19 = vadd.f32 %v1351_v9, %v771_v18  ;;  %1496 = vmatprep.mubr.f32.mxu1 %v780_v15  ;;  %v1354_v18 = vld [vmem:[%s3589_s0] ss:$0 sm:$0xff]  ;;  %s4042_s0 = smov %s4041_s14 }
 0x30c   : > { %1497 = vmatmul.mubr.f32.vlgmr.msra.gmra.mrb[0].mxu1 %v781_v16  ;;  %v783_v21 = vmax.f32 %v777_v17, 0.0 }
 0x30d   : > { %v782_v20 = vmax.f32 %v772_v19, 0.0  ;;  %1644 = vmatpush3.bf16.msra.mxu1 %v1604_v55 }
 0x30e   : > { %1637 = vmatprep.subr.bf16.mxu1 %v1608_v57 }
 0x30f   : > { %1499 = vmatprep.mubr.f32.mxu1 %v782_v20  ;;  %v1355_v20 = vld [vmem:[%s3596_s4] ss:$0 sm:$0xff] }
 0x310   : > { %1500 = vmatmul.mubr.f32.gmra.mrb[2].mxu1 %v783_v21 }
 0x311   : > { %1645 = vmatpush3.bf16.msra.mxu1 %v1608_v57 }
 0x312   : > { %1638 = vmatprep.subr.bf16.mxu1 %v1612_v60 }
 0x315   : > { %1646 = vmatpush3.bf16.msra.mxu1 %v1612_v60 }
 0x316   : > { %1639 = vmatprep.subr.bf16.mxu1 %v1616_v63 }
 0x319   : > { %1647 = vmatpush3.bf16.msra.mxu1 %v1616_v63 }
 0x31a   : > { %1640 = vmatprep.subr.bf16.mxu1 %v1620_v2 }
 0x31d   : > { %1648 = vmatpush3.bf16.msra.mxu1 %v1620_v2 }
 0x31e   : > { %1641 = vmatprep.subr.bf16.mxu1 %v1624_v5 }
 0x321   : > { %1649 = vmatpush3.bf16.msra.mxu1 %v1624_v5 }
 0x322   : > { %1642 = vmatprep.subr.bf16.mxu1 %v1628_v8 }
 0x325   : > { %1650 = vmatpush3.bf16.msra.mxu1 %v1628_v8 }
 0x326   : > { %1643 = vmatprep.subr.bf16.mxu1 %v1632_v24 }
 0x329   : > { %1651 = vmatpush3.bf16.msra.mxu1 %v1632_v24 }
 0x3df   : > { %v1498_v26 = vpop.f32.mrb[0].mxu1 }
 0x3e0   : > { %v879_v27 = vadd.f32 %v1498_v26, %v1352_v25  ;;  %v873_v28 = vpop.f32.mrb[1].mxu1 }
 0x3e1   : > { %v874_v29 = vadd.f32 %v1352_v25, %v873_v28 }
 0x3e2   : > { %v893_v32 = vmax.f32 %v879_v27, 0.0 }
 0x3e3   : > { %v892_v30 = vmax.f32 %v874_v29, 0.0  ;;  %v1501_v31 = vpop.f32.mrb[2].mxu1 }
 0x3e4   : > { %v889_v33 = vadd.f32 %v1501_v31, %v1352_v25  ;;  %v883_v34 = vpop.f32.mrb[3].mxu1 }
 0x3e5   : > { %v884_v35 = vadd.f32 %v1352_v25, %v883_v34  ;;  %1534 = vmatprep.mubr.f32.mxu0 %v892_v30 }
 0x3e6   : > { %1535 = vmatmul.mubr.f32.vlgmr.msra.gmra.mrb[4].mxu0 %v893_v32  ;;  %v895_v37 = vmax.f32 %v889_v33, 0.0 }
 0x3e7   : > { %v894_v36 = vmax.f32 %v884_v35, 0.0 }
 0x3e9   : > { %1537 = vmatprep.mubr.f32.mxu1 %v894_v36 }
 0x3ea   : > { %1538 = vmatmul.mubr.f32.vlgmr.msra.gmra.mrb[4].mxu1 %v895_v37 }
 0x4b9   : > { %v1536_v39 = vpop.f32.mrb[4].mxu0 }
 0x4ba   : > { %v985_v40 = vpop.f32.mrb[5].mxu0  ;;  %v991_v44 = vadd.f32 %v1536_v39, %v1353_v38 }
 0x4bb   : > { %v986_v41 = vadd.f32 %v1353_v38, %v985_v40 }
 0x4bd   : > { %v1539_v42 = vpop.f32.mrb[4].mxu1  ;;  %1004 = vadd.xlane.f32.xlu0 %v986_v41 }
 0x4be   : > { %v995_v43 = vpop.f32.mrb[5].mxu1  ;;  %v1001_v46 = vadd.f32 %v1539_v42, %v1353_v38 }
 0x4bf   : > { %v996_v45 = vadd.f32 %v1353_v38, %v995_v43 }
 0x4c1   : > { %1008 = vadd.xlane.f32.xlu1 %v996_v45  ;;  %1006 = vadd.xlane.f32.xlu0 %v991_v44 }
 0x4c5   : > { %1010 = vadd.xlane.f32.xlu1 %v1001_v46 }
 0x54a   : > { %v1005_v49 = vpop.xlane.xlu0 %1004 }
 0x54b   : > { %v1012_v50 = vmul.f32 0.03125, %v1005_v49 }
 0x54d   : > { %v1019_v51 = vsub.f32 %v986_v41, %v1012_v50 }
 0x54e   : > { %v1009_v52 = vpop.xlane.xlu1 %1008  ;;  %v1007_v53 = vpop.xlane.xlu0 %1006 }
 0x54f   : > { %v1014_v54 = vmul.f32 0.03125, %v1009_v52  ;;  %v1013_v55 = vmul.f32 0.03125, %v1007_v53  ;;  %v1023_v56 = vsel %vm1018_vm0, %v1019_v51, 0.0 }
 0x550   : > { %v1027_v57 = vmul.f32 %v1023_v56, %v1023_v56 }
 0x551   : > { %v1021_v58 = vsub.f32 %v996_v45, %v1014_v54  ;;  %v1020_v59 = vsub.f32 %v991_v44, %v1013_v55 }
 0x552   : > { %v1011_v60 = vpop.xlane.xlu1 %1010  ;;  %1031 = vadd.xlane.f32.xlu0 %v1027_v57 }
 0x553   : > { %v1015_v61 = vmul.f32 0.03125, %v1011_v60  ;;  %v1025_v62 = vsel %vm1018_vm0, %v1021_v58, 0.0  ;;  %v1024_v63 = vsel %vm1018_vm0, %v1020_v59, 0.0 }
 0x554   : > { %v1029_v0 = vmul.f32 %v1025_v62, %v1025_v62  ;;  %v1028_v1 = vmul.f32 %v1024_v63, %v1024_v63 }
 0x555   : > { %v1022_v2 = vsub.f32 %v1001_v46, %v1015_v61 }
 0x556   : > { %1035 = vadd.xlane.f32.xlu0 %v1029_v0  ;;  %1033 = vadd.xlane.f32.xlu1 %v1028_v1 }
 0x557   : > { %v1026_v3 = vsel %vm1018_vm0, %v1022_v2, 0.0 }
 0x558   : > { %v1030_v4 = vmul.f32 %v1026_v3, %v1026_v3 }
 0x55a   : > { %1037 = vadd.xlane.f32.xlu1 %v1030_v4 }
 0x5df   : > { %v1032_v5 = vpop.xlane.xlu0 %1031 }
 0x5e0   : > { %v1039_v6 = vmul.f32 0.03125, %v1032_v5 }
 0x5e2   : > { %v1043_v7 = vadd.f32 1e-05, %v1039_v6 }
 0x5e3   : > { %v1034_v8 = vpop.xlane.xlu1 %1033  ;;  %v1036_v9 = vpop.xlane.xlu0 %1035 }
 0x5e4   : > { %1967 = vrsqrt.f32 %v1043_v7  ;;  %v1040_v10 = vmul.f32 0.03125, %v1034_v8  ;;  %v1041_v11 = vmul.f32 0.03125, %v1036_v9 }
 0x5e6   : > { %v1044_v12 = vadd.f32 1e-05, %v1040_v10  ;;  %v1045_v13 = vadd.f32 1e-05, %v1041_v11 }
 0x5e7   : > { %v1038_v14 = vpop.xlane.xlu1 %1037 }
 0x5e8   : > { %1969 = vrsqrt.f32 %v1044_v12  ;;  %v1042_v15 = vmul.f32 0.03125, %v1038_v14 }
 0x5e9   : > { %1971 = vrsqrt.f32 %v1045_v13 }
 0x5ea   : > { %v1046_v16 = vadd.f32 1e-05, %v1042_v15 }
 0x5ec   : > { %1973 = vrsqrt.f32 %v1046_v16 }
 0x5ee   : > { %v1968_v17 = vpop.eup %1967 }
 0x5ef   : > { %v1051_v19 = vmul.f32 %v1968_v17, %v1023_v56 }
 0x5f1   : > { %v1062_v21 = vmul.f32 %v1354_v18, %v1051_v19 }
 0x5f2   : > { %v1970_v22 = vpop.eup %1969 }
 0x5f3   : > { %v1972_v23 = vpop.eup %1971  ;;  %v1073_v24 = vadd.f32 %v1355_v20, %v1062_v21  ;;  %v1052_v25 = vmul.f32 %v1970_v22, %v1024_v63 }
 0x5f4   : > { %v1053_v26 = vmul.f32 %v1972_v23, %v1025_v62 }
 0x5f5   : > { %1077 = vst [vmem:[%s657_s5] sm:$0xff] %v1073_v24  ;;  %v1063_v27 = vmul.f32 %v1354_v18, %v1052_v25 }
 0x5f6   : > { %v1974_v28 = vpop.eup %1973  ;;  %v1064_v29 = vmul.f32 %v1354_v18, %v1053_v26 }
 0x5f7   : > { %v1074_v30 = vadd.f32 %v1355_v20, %v1063_v27  ;;  %v1054_v31 = vmul.f32 %v1974_v28, %v1026_v3 }
 0x5f8   : > { %v1075_v32 = vadd.f32 %v1355_v20, %v1064_v29 }
 0x5f9   : > { %1078 = vst [vmem:[%s657_s5 + $0x8] sm:$0xff] %v1074_v30  ;;  %v1065_v33 = vmul.f32 %v1354_v18, %v1054_v31 }
 0x5fa   : > { %1079 = vst [vmem:[%s657_s5 + $0x10] sm:$0xff] %v1075_v32 }
 0x5fb   : > { %v1076_v34 = vadd.f32 %v1355_v20, %v1065_v33 }
 0x5fd   : > { %1080 = vst [vmem:[%s657_s5 + $0x18] sm:$0xff] %v1076_v34 }
 0x5fe   : > { %2268 = shalt.err (!%p2265_p13)
}
 0x5ff   : > { %s2269_s11 = scalar_lea.hbm %s3669_s9, 512  ;;  %s2273_s21 = scalar_lea.hbm %s4042_s0, 1024 }
 0x600   : > { %p2270_p5 = scmp.ne.s32.totalorder %s3669_s9, %s2269_s11  ;;  %p2274_p9 = scmp.lt.u32.totalorder %s3669_s9, %s4042_s0 }
 0x601   : > { %p2275_p11 = scmp.lt.u32.totalorder %s2273_s21, %s2269_s11  ;;  %p2277_p4 = scmp.lt.u32.totalorder %s2269_s11, %s3669_s9 }
 0x602   : > { %p2271_p7 = pnand %p2270_p5, %p4043_p3 }
 0x603   : > { %p2276_p1 = por %p2275_p11, %p2274_p9 }
 0x604   : > { %p2272_p6 = pneg %p2271_p7 }
 0x605   : > { %p2278_p2 = por %p2277_p4, %p2276_p1 }
 0x607   : > { %p2279_p10 = pnand %p2278_p2, %p2272_p6 }
 0x609   : > { %2282 = shalt.err (!%p2279_p10)
}
 0x60a   : > { %s2562_s29 = smov 128   ;;  %s2563_s4 = smov 8  }
 0x60b   : > { %1686 = dma.vmem_to_hbm [thread:$0]  (%p4043_p3), %s3671_s7, 512, %s3669_s9, %s1082_s1, %s2562_s29, %s2562_s29, %s2563_s4  }
 0x60c PF: > { %s4044_s5 = sld [smem:[#allocation64_spill]]  ;;  %s4045_s27 = sld [smem:[#allocation75_spill]] }
 0x60d   : > { %p4047_p0 = scmp.ge.s32.totalorder %s2547_s8, 2 }
 0x612   : > { %s1110_s24 = sand.u32 1, %s4044_s5   ;;  %p4046_p12 = scmp.ne.s32.totalorder %s4045_s27, 0 }
 0x613   : > { %s1111_s6 = scalar_lea.sflag [#allocation6], %s1110_s24 }
 0x614   : > { %p1733_p8 = pnand %p4047_p0, %p4046_p12 }
 0x616   : > { %2434 = dma.done.wait (!%p1733_p8), %s1111_s6, 512  }
 0x617   : > { %2436 = vsyncadd (!%p1733_p8), %s1111_s6, 4294966784  ;;  %s4048_s23 = sld [smem:[#allocation48_spill]]  ;;  %s4049_s24 = sld [smem:[#allocation49_spill]] }
 0x618   : > { %s4050_s14 = sld [smem:[#allocation50_spill]]  ;;  %s4051_s27 = sld [smem:[#allocation71_spill]] }
 0x619   : > { %s4052_s28 = sld [smem:[#allocation52_spill]]  ;;  %s4053_s29 = sld [smem:[#allocation53_spill]] }
 0x61a   : > { %s4054_s30 = sld [smem:[#allocation47_spill]]  ;;  %s4055_s20 = sld [smem:[#allocation54_spill]] }
 0x61b   : > { %s4056_s13 = sld [smem:[#allocation69_spill]]  ;;  %s4057_s7 = sld [smem:[#allocation56_spill]] }
 0x61c   : > { %s4058_s15 = sld [smem:[#allocation57_spill]]  ;;  %s4059_s8 = sld [smem:[#allocation77_spill]] }
 0x61d   : > { %p39_p3 = scmp.ge.s32.totalorder %s3895_s16, 4   ;;  %s4060_s9 = sld [smem:[#allocation58_spill]] }
 0x61e   : > { %s4061_s19 = sld [smem:[#allocation68_spill]]  ;;  %s4063_s1 = sld [smem:[#allocation60_spill]] }
 0x61f   : > { %4062 = sst [smem:[#allocation47_spill]] %s4121_s22  ;;  %s4064_s25 = smov %s2455_s26 }
 0x620   : > { %s4065_s21 = sld [smem:[#allocation61_spill]]  ;;  %s4066_s26 = smov %s4050_s14 }
 0x621   : > { %s4067_s22 = sld [smem:[#allocation76_spill]]  ;;  %s4069_s4 = sld [smem:[#allocation63_spill]] }
 0x622   : > { %s4068_s10 = sld [smem:[#allocation62_spill]]  ;;  %s4070_s5 = sld [smem:[#allocation67_spill]] }
 0x623   : > { %s4071_s11 = smov %s2479_s12  ;;  %s4072_s6 = sld [smem:[#allocation65_spill]] }
 0x624   : > { %s4073_s12 = smov %s4055_s20  ;;  %s4074_s0 = sld [smem:[#allocation72_spill]] }
 0x625   : > { %s4075_s2 = smov %s3895_s16  ;;  %s4076_s14 = smov %s4057_s7 }
 0x626   : > { %s4078_s16 = smov %s4059_s8  ;;  %4079 = sst [smem:[#allocation48_spill]] %s2503_s18 }
 0x627   : > { %s4080_s18 = smov %s4060_s9  ;;  %s4081_s20 = smov %s4063_s1 }
 0x628   : > { %s4082_s9 = smov %s4069_s4  ;;  %s4083_s7 = smov %s4070_s5 }
 0x629   : > { %s4084_s5 = smov %s2539_s3  ;;  %s4085_s3 = smov %s4072_s6 }
 0x62a   : > { %s4086_s1 = smov %s4074_s0  ;;  %s4087_s8 = smov %s4075_s2 }
 0x62b   :  { %41 = sbr.rel (!%p39_p3) target bundleno = 43 (0x2b), region = 197 }
 0x632   :  { %1116 = vsyncpa [#allocation5], 1 }
 0x633   :  { %1118 = vsyncpa [#allocation5 + $0x1], 1 }
 0x634   :  { %1119 = vsyncpa [#allocation8], 1 }
 0x635   :  { %1121 = vsyncpa [#allocation8 + $0x1], 1 }
 0x636   :  { %1122 = vsyncpa [#allocation11], 1 }
 0x637   :  { %1124 = vsyncpa [#allocation11 + $0x1], 1 }
 0x638   :  { %1125 = vsyncpa [#allocation14], 1 }
 0x639   :  { %1127 = vsyncpa [#allocation14 + $0x1], 1 }
 0x63a   :  { %1128 = vsyncpa [#allocation17], 1 }
 0x63b   :  { %1130 = vsyncpa [#allocation17 + $0x1], 1 }
 0x63c   :  { %1131 = vsyncpa [#allocation6], 1 }
 0x63d   :  { %1133 = vsyncpa [#allocation6 + $0x1], 1 }

</bundles_post_ra>
